<compile_context>
chip_gen: v7x
topology: tpu7x:2x2x1
jax: 0.10.0
libtpu: 0.0.40
codegen_flags: <defaults>
</compile_context>

<pallas_src>
import math

import numpy as np
import jax
import jax.numpy as jnp
from jax import lax
from jax.experimental import pallas as pl
from jax.experimental.pallas import tpu as pltpu

NEG_INF = -1e30

_VMEM_LIMIT = None


def _vmem_limit_bytes():
    """Generation-aware VMEM budget (conservative on v7x, generous on v5e/v6e)."""
    global _VMEM_LIMIT
    if _VMEM_LIMIT is None:
        try:
            cap = int(pltpu.get_tpu_info().vmem_capacity_bytes)
        except Exception:
            cap = 64 * 1024 * 1024
        _VMEM_LIMIT = int(min(cap - 16 * 1024 * 1024, 100 * 1024 * 1024))
    return _VMEM_LIMIT


def _pick_tile(n, cap=256):
    """Largest tile <= cap that divides n (falls back to n itself)."""
    for c in (256, 128, 64, 32, 16, 8):
        if c <= cap and c <= n and n % c == 0:
            return c
    return n


def _band_tile(n, w):
    """Band-attention tile: ~one-sided window, clipped to [8, 128], dividing n."""
    target = max(8, min(128, w))
    for c in (128, 64, 32, 16, 8):
        if c <= target and n % c == 0:
            return c
    return _pick_tile(n, cap=128)


# ----------------------------------------------------------------------------
# Fused Q/K/V (+ global Q/K/V) projection: one activation read, six bf16 outs.
# ----------------------------------------------------------------------------
def _fused_proj_kernel(x_ref, w_ref, b_ref, *o_refs):
    y = jnp.dot(x_ref[...], w_ref[...], preferred_element_type=jnp.float32)
    y = y + b_ref[...]
    d_out = o_refs[0].shape[-1]
    for i, o_ref in enumerate(o_refs):
        o_ref[...] = y[:, i * d_out:(i + 1) * d_out].astype(o_ref.dtype)


def fused_projections(flat, w_fused, b_fused):
    """flat: (M, Din) bf16; w_fused: (Din, 6*D) bf16; b_fused: (6*D,) f32.
    Returns six (M, D) bf16 arrays: q, k, v, q_global, k_global, v_global."""
    M, Din = flat.shape
    Dout6 = w_fused.shape[1]
    D = Dout6 // 6
    TM = _pick_tile(M)
    out_shape = tuple(jax.ShapeDtypeStruct((M, D), jnp.bfloat16) for _ in range(6))
    return pl.pallas_call(
        _fused_proj_kernel,
        out_shape=out_shape,
        grid=(M // TM,),
        in_specs=[
            pl.BlockSpec((TM, Din), lambda i: (i, 0)),
            # TODO(synk): on v7x with large Din, single-buffer this constant
            # weight block (pipeline_mode=pl.Buffered(1)) to halve its footprint.
            pl.BlockSpec((Din, Dout6), lambda i: (0, 0)),
            pl.BlockSpec((1, Dout6), lambda i: (0, 0)),
        ],
        out_specs=[pl.BlockSpec((TM, D), lambda i: (i, 0))] * 6,
        compiler_params=pltpu.CompilerParams(
            dimension_semantics=("parallel",),
            vmem_limit_bytes=_vmem_limit_bytes()),
    )(flat, w_fused, b_fused.reshape(1, Dout6))


# ----------------------------------------------------------------------------
# Local banded attention, joint softmax with the global-key columns,
# flash-style online softmax over band key tiles; global rows overwritten
# in-kernel from the precomputed global-query output (no XLA scatter).
# ----------------------------------------------------------------------------
def _make_local_kernel(T, KT, KB, L, w):
    def kernel(q_ref, k_ref, v_ref, kgs_ref, vgs_ref, gout_ref, gpos_ref,
               o_ref, acc_ref, m_ref, l_ref):
        qi = pl.program_id(1)
        kb = pl.program_id(2)
        num_heads = acc_ref.shape[0]

        q = q_ref[...]                                          # (H, T, d) bf16

        # ---- band step 0: init joint softmax stats from the global-key cols.
        # Global keys inside the band are double counted, like the reference.
        @pl.when(kb == 0)
        def _():
            kg = kgs_ref[...]                                   # (H, G, d) bf16
            vg = vgs_ref[...]
            s0 = jnp.einsum('hqd,hkd->hqk', q, kg,
                            preferred_element_type=jnp.float32)  # (H, T, G)
            m0 = jnp.max(s0, axis=-1, keepdims=True)
            p0 = jnp.exp(s0 - m0)
            m_ref[...] = m0
            l_ref[...] = jnp.sum(p0, axis=-1, keepdims=True)
            acc_ref[...] = jnp.einsum('hqk,hkd->hqd', p0.astype(jnp.bfloat16),
                                      vg, preferred_element_type=jnp.float32)

        # ---- banded local key tile: online softmax update (skip tiles that
        # fall entirely outside the window near the sequence edges).
        start = jnp.maximum(jnp.minimum(qi - L, KT - KB), 0)
        j = start + kb                                          # key tile index
        overlaps = jnp.logical_and((j + 1) * T - 1 >= qi * T - w,
                                   j * T <= qi * T + T - 1 + w)

        @pl.when(overlaps)
        def _():
            k = k_ref[...]                                      # (H, T, d) bf16
            v = v_ref[...]
            s = jnp.einsum('hqd,hkd->hqk', q, k,
                           preferred_element_type=jnp.float32)   # (H, T, T)
            row = qi * T + lax.broadcasted_iota(jnp.int32, (T, T), 0)
            col = j * T + lax.broadcasted_iota(jnp.int32, (T, T), 1)
            band = (jnp.abs(row - col) <= w)[None, :, :]
            s = jnp.where(band, s, NEG_INF)
            m_prev = m_ref[...]
            m_new = jnp.maximum(m_prev, jnp.max(s, axis=-1, keepdims=True))
            alpha = jnp.exp(m_prev - m_new)
            p = jnp.exp(s - m_new)
            m_ref[...] = m_new
            l_ref[...] = alpha * l_ref[...] + jnp.sum(p, axis=-1, keepdims=True)
            acc_ref[...] = alpha * acc_ref[...] + jnp.einsum(
                'hqk,hkd->hqd', p.astype(jnp.bfloat16), v,
                preferred_element_type=jnp.float32)

        # ---- finalize: normalize, overwrite global rows, lane-dense store ---
        @pl.when(kb == KB - 1)
        def _():
            inv_l = pl.reciprocal(l_ref[...], approx=True)       # (H, T, 1)
            local = jnp.concatenate(
                [acc_ref[h] * inv_l[h] for h in range(num_heads)],
                axis=-1)                                         # (T, D) f32
            rows = qi * T + lax.broadcasted_iota(jnp.int32, (T, 1), 0)
            onehot = (rows == gpos_ref[...]).astype(jnp.float32)  # (T, G)
            is_glob = jnp.sum(onehot, axis=-1, keepdims=True) > 0.0
            repl = jnp.dot(onehot, gout_ref[...],
                           preferred_element_type=jnp.float32)    # (T, D)
            o_ref[...] = jnp.where(is_glob, repl, local).astype(o_ref.dtype)

    return kernel


def local_band_attention(q, k, v, kg_sel, vg_sel, gout, gpos_arr, *, one_sided):
    """q,k,v: (B, H, N, d) bf16; kg_sel,vg_sel: (B, H, G, d) bf16;
    gout: (B, G, H*d) f32; gpos_arr: (1, G) int32.  Returns (B, N, H*d) f32."""
    B, H, N, d = q.shape
    G = kg_sel.shape[2]
    D = H * d
    T = _band_tile(N, one_sided)
    QT = N // T
    KT = QT
    L = -(-one_sided // T)              # ceil(window / tile)
    KB = min(2 * L + 1, KT)             # band key tiles visited per query tile

    def kv_map(b, qi, kb):
        start = jnp.maximum(jnp.minimum(qi - L, KT - KB), 0)
        return (b, 0, start + kb, 0)

    kernel = _make_local_kernel(T, KT, KB, L, one_sided)
    return pl.pallas_call(
        kernel,
        out_shape=jax.ShapeDtypeStruct((B, N, D), jnp.float32),
        grid=(B, QT, KB),
        in_specs=[
            pl.BlockSpec((None, H, T, d), lambda b, qi, kb: (b, 0, qi, 0)),   # Q
            # TODO(synk): on v6e (128 MiB VMEM) deepen the K/V band stream with
            # pipeline_mode=pl.Buffered(3) to hide DMA behind the short compute.
            pl.BlockSpec((None, H, T, d), kv_map),                            # K
            pl.BlockSpec((None, H, T, d), kv_map),                            # V
            pl.BlockSpec((None, H, G, d), lambda b, qi, kb: (b, 0, 0, 0)),    # K@gpos
            pl.BlockSpec((None, H, G, d), lambda b, qi, kb: (b, 0, 0, 0)),    # V@gpos
            pl.BlockSpec((None, G, D), lambda b, qi, kb: (b, 0, 0)),          # gout
            pl.BlockSpec((1, G), lambda b, qi, kb: (0, 0)),                   # gpos
        ],
        out_specs=pl.BlockSpec((None, T, D), lambda b, qi, kb: (b, qi, 0)),
        scratch_shapes=[
            pltpu.VMEM((H, T, d), jnp.float32),   # accumulator
            pltpu.VMEM((H, T, 1), jnp.float32),   # running max
            pltpu.VMEM((H, T, 1), jnp.float32),   # running sum
        ],
        compiler_params=pltpu.CompilerParams(
            dimension_semantics=("parallel", "parallel", "arbitrary"),
            vmem_limit_bytes=_vmem_limit_bytes()),
    )(q, k, v, kg_sel, vg_sel, gout, gpos_arr)


# ----------------------------------------------------------------------------
# Global-query path: global tokens attend to every token with the *_global
# projections (online softmax over key tiles), head-batched einsums.
# ----------------------------------------------------------------------------
def _make_global_kernel(KT):
    def kernel(qg_ref, k_ref, v_ref, o_ref, acc_ref, m_ref, l_ref):
        kt = pl.program_id(1)
        num_heads = acc_ref.shape[0]

        @pl.when(kt == 0)
        def _():
            m_ref[...] = jnp.full(m_ref.shape, NEG_INF, dtype=jnp.float32)
            l_ref[...] = jnp.zeros(l_ref.shape, dtype=jnp.float32)
            acc_ref[...] = jnp.zeros(acc_ref.shape, dtype=jnp.float32)

        qg = qg_ref[...]                                        # (H, G, d) bf16
        k = k_ref[...]                                          # (H, Tg, d) bf16
        v = v_ref[...]
        s = jnp.einsum('hqd,hkd->hqk', qg, k,
                       preferred_element_type=jnp.float32)       # (H, G, Tg)
        m_prev = m_ref[...]
        m_new = jnp.maximum(m_prev, jnp.max(s, axis=-1, keepdims=True))
        alpha = jnp.exp(m_prev - m_new)
        p = jnp.exp(s - m_new)
        m_ref[...] = m_new
        l_ref[...] = alpha * l_ref[...] + jnp.sum(p, axis=-1, keepdims=True)
        acc_ref[...] = alpha * acc_ref[...] + jnp.einsum(
            'hqk,hkd->hqd', p.astype(jnp.bfloat16), v,
            preferred_element_type=jnp.float32)

        @pl.when(kt == KT - 1)
        def _():
            inv_l = pl.reciprocal(l_ref[...], approx=True)
            o_ref[...] = jnp.concatenate(
                [acc_ref[h] * inv_l[h] for h in range(num_heads)],
                axis=-1).astype(o_ref.dtype)

    return kernel


def global_query_attention(qg_sel, k_all, v_all):
    """qg_sel: (B, H, G, d) bf16; k_all, v_all: (B, H, N, d) bf16.
    Returns (B, G, H*d) f32."""
    B, H, G, d = qg_sel.shape
    N = k_all.shape[2]
    D = H * d
    Tg = _pick_tile(N)
    KT = N // Tg
    return pl.pallas_call(
        _make_global_kernel(KT),
        out_shape=jax.ShapeDtypeStruct((B, G, D), jnp.float32),
        grid=(B, KT),
        in_specs=[
            pl.BlockSpec((None, H, G, d), lambda b, kt: (b, 0, 0, 0)),
            pl.BlockSpec((None, H, Tg, d), lambda b, kt: (b, 0, kt, 0)),
            pl.BlockSpec((None, H, Tg, d), lambda b, kt: (b, 0, kt, 0)),
        ],
        out_specs=pl.BlockSpec((None, G, D), lambda b, kt: (b, 0, 0)),
        scratch_shapes=[
            pltpu.VMEM((H, G, d), jnp.float32),
            pltpu.VMEM((H, G, 1), jnp.float32),
            pltpu.VMEM((H, G, 1), jnp.float32),
        ],
        compiler_params=pltpu.CompilerParams(
            dimension_semantics=("parallel", "arbitrary"),
            vmem_limit_bytes=_vmem_limit_bytes()),
    )(qg_sel, k_all, v_all)


# ----------------------------------------------------------------------------
# Module forward (glue in plain JAX, hot path in Pallas)
# ----------------------------------------------------------------------------
def init_params(key, token_dim):
    names = ["query", "key", "value", "query_global", "key_global", "value_global"]
    params = {}
    for i, name in enumerate(names):
        kw, kb = jax.random.split(jax.random.fold_in(key, i))
        params[name] = (
            0.02 * jax.random.normal(kw, (token_dim, token_dim), jnp.float32),
            0.02 * jax.random.normal(kb, (token_dim,), jnp.float32),
        )
    return params


def longformer_attention_block_forward(x, params, *, window_size, num_heads,
                                       attention_window, num_global):
    B, C, H, W = x.shape
    ws = window_size
    ns = H // ws
    D = C * ws * ws
    N = ns * ns
    assert D % num_heads == 0
    d = D // num_heads

    # --- tokenize: x.unfold(2,ws,ws).unfold(3,ws,ws) -> view -> permute -> view
    t = x.reshape(B, C, ns, ws, ns, ws)
    t = jnp.transpose(t, (0, 1, 2, 4, 3, 5)).reshape(B, C, N, ws * ws)
    tokens = jnp.transpose(t, (0, 2, 1, 3)).reshape(B, N, D)

    # --- static global positions: linspace -> bool mask collapses duplicates.
    gpos = np.unique(
        np.linspace(0, N - 1, num_global).astype(np.int64)).astype(np.int32)
    G = int(gpos.shape[0])
    assert G >= 1
    gpos_arr = jnp.asarray(gpos).reshape(1, G)

    # --- fused Q/K/V (+ global Q/K/V) projections; 1/sqrt(d) folded into the
    #     query / query_global weights and biases at trace time.
    scale = 1.0 / math.sqrt(d)
    names = ["query", "key", "value", "query_global", "key_global", "value_global"]
    scales = {"query": scale, "query_global": scale}
    w_fused = jnp.concatenate(
        [params[n][0] * scales.get(n, 1.0) for n in names],
        axis=1).astype(jnp.bfloat16)
    b_fused = jnp.concatenate(
        [params[n][1] * scales.get(n, 1.0) for n in names],
        axis=0).astype(jnp.float32)

    flat = tokens.reshape(B * N, D).astype(jnp.bfloat16)
    q, k, v, qg, kg, vg = fused_projections(flat, w_fused, b_fused)

    def to_heads(a):                            # (B*N, D) bf16 -> (B, H, N, d)
        return a.reshape(B, N, num_heads, d).transpose(0, 2, 1, 3)

    q_h, k_h, v_h = to_heads(q), to_heads(k), to_heads(v)
    kg_all, vg_all = to_heads(kg), to_heads(vg)

    # Tiny static-index gathers stay in XLA.
    # TODO(synk): could move these in-kernel via PrefetchScalarGridSpec(gpos).
    kg_sel = k_h[:, :, gpos, :]                 # local K/V at global positions
    vg_sel = v_h[:, :, gpos, :]
    qg_sel = to_heads(qg)[:, :, gpos, :]        # global-query rows

    one_sided = attention_window // 2           # HF convention

    gout = global_query_attention(qg_sel, kg_all, vg_all)          # (B, G, D) f32
    attn = local_band_attention(q_h, k_h, v_h, kg_sel, vg_sel, gout, gpos_arr,
                                one_sided=one_sided)               # (B, N, D) f32

    # --- fold tokens back to the NCHW image ---
    out = attn.reshape(B, ns, ns, C, ws, ws)
    out = jnp.transpose(out, (0, 3, 1, 4, 2, 5)).reshape(B, C, ns * ws, ns * ws)
    return out


if __name__ == "__main__":
    key = jax.random.PRNGKey(0)

    # small, module-consistent shapes
    B, C, H, W = 2, 4, 16, 16
    window_size = 2
    num_heads = 2            # token_dim = C*ws*ws = 16 -> head_dim = 8
    attention_window = 16    # scaled down from 256 so the band matters at N=64
    num_global = 8           # scaled down from 50 to fit N = 64

    kx, kp = jax.random.split(key)
    x = jax.random.normal(kx, (B, C, H, W), jnp.float32)
    token_dim = C * window_size ** 2
    params = init_params(kp, token_dim)

    @jax.jit
    def fwd(xx, pp):
        return longformer_attention_block_forward(
            xx, pp, window_size=window_size, num_heads=num_heads,
            attention_window=attention_window, num_global=num_global)

    out = jax.block_until_ready(fwd(x, params))

    assert out.shape == (B, C, H, W), out.shape
    assert bool(jnp.all(jnp.isfinite(out)))
    print("KERNEL_OK")
</pallas_src>

<mosaic_0001>
module attributes {stable_mosaic.version = 11 : i64} {
  func.func @_fused_proj_kernel(%arg0: i32, %arg1: memref<128x16xbf16, #tpu.memory_space<vmem>>, %arg2: memref<16x96xbf16, #tpu.memory_space<vmem>>, %arg3: memref<1x96xf32, #tpu.memory_space<vmem>>, %arg4: memref<128x16xbf16, #tpu.memory_space<vmem>>, %arg5: memref<128x16xbf16, #tpu.memory_space<vmem>>, %arg6: memref<128x16xbf16, #tpu.memory_space<vmem>>, %arg7: memref<128x16xbf16, #tpu.memory_space<vmem>>, %arg8: memref<128x16xbf16, #tpu.memory_space<vmem>>, %arg9: memref<128x16xbf16, #tpu.memory_space<vmem>>) attributes {dimension_semantics = [#tpu.dimension_semantics<parallel>], iteration_bounds = array<i64: 1>, scalar_prefetch = 0 : i64, scratch_operands = 0 : i64, tpu.core_type = #tpu.core_type<tc>, window_params = [{transform_indices = @transform_0, window_bounds = array<i64: 128, 16>}, {pipeline_mode = #tpu.pipeline_mode<synchronous>, transform_indices = @transform_1, window_bounds = array<i64: 16, 96>}, {pipeline_mode = #tpu.pipeline_mode<synchronous>, transform_indices = @transform_2, window_bounds = array<i64: 1, 96>}, {transform_indices = @transform_3, window_bounds = array<i64: 128, 16>}, {transform_indices = @transform_4, window_bounds = array<i64: 128, 16>}, {transform_indices = @transform_5, window_bounds = array<i64: 128, 16>}, {transform_indices = @transform_6, window_bounds = array<i64: 128, 16>}, {transform_indices = @transform_7, window_bounds = array<i64: 128, 16>}, {transform_indices = @transform_8, window_bounds = array<i64: 128, 16>}]} {
    %c0 = arith.constant 0 : index
    %c0_0 = arith.constant 0 : index
    %0 = vector.load %arg1[%c0, %c0_0] : memref<128x16xbf16, #tpu.memory_space<vmem>>, vector<128x16xbf16>
    %c0_1 = arith.constant 0 : index
    %c0_2 = arith.constant 0 : index
    %1 = vector.load %arg2[%c0_1, %c0_2] : memref<16x96xbf16, #tpu.memory_space<vmem>>, vector<16x96xbf16>
    %cst = arith.constant dense<0.000000e+00> : vector<128x96xf32>
    %2 = tpu.matmul %0, %1, %cst {dimension_numbers = #tpu.dot_dimension_numbers<[1], [0], [0], [1], [0, 0, 1, 1], [], []>} : vector<128x16xbf16>, vector<16x96xbf16>, vector<128x96xf32> -> vector<128x96xf32>
    %c0_3 = arith.constant 0 : index
    %c0_4 = arith.constant 0 : index
    %3 = vector.load %arg3[%c0_3, %c0_4] : memref<1x96xf32, #tpu.memory_space<vmem>>, vector<1x96xf32>
    %4 = vector.broadcast %3 : vector<1x96xf32> to vector<128x96xf32>
    %5 = arith.addf %2, %4 : vector<128x96xf32>
    %6 = vector.extract_strided_slice %5 {offsets = [0, 0], sizes = [128, 16], strides = [1, 1]} : vector<128x96xf32> to vector<128x16xf32>
    %7 = arith.truncf %6 : vector<128x16xf32> to vector<128x16xbf16>
    %c0_5 = arith.constant 0 : index
    %c0_6 = arith.constant 0 : index
    %8 = vector.load %arg4[%c0_5, %c0_6] : memref<128x16xbf16, #tpu.memory_space<vmem>>, vector<128x16xbf16>
    tpu.vector_store %arg4[%c0_5, %c0_6], %7 {strides = array<i32>} : memref<128x16xbf16, #tpu.memory_space<vmem>>, vector<128x16xbf16>,
    %9 = vector.extract_strided_slice %5 {offsets = [0, 16], sizes = [128, 16], strides = [1, 1]} : vector<128x96xf32> to vector<128x16xf32>
    %10 = arith.truncf %9 : vector<128x16xf32> to vector<128x16xbf16>
    %c0_7 = arith.constant 0 : index
    %c0_8 = arith.constant 0 : index
    %11 = vector.load %arg5[%c0_7, %c0_8] : memref<128x16xbf16, #tpu.memory_space<vmem>>, vector<128x16xbf16>
    tpu.vector_store %arg5[%c0_7, %c0_8], %10 {strides = array<i32>} : memref<128x16xbf16, #tpu.memory_space<vmem>>, vector<128x16xbf16>,
    %12 = vector.extract_strided_slice %5 {offsets = [0, 32], sizes = [128, 16], strides = [1, 1]} : vector<128x96xf32> to vector<128x16xf32>
    %13 = arith.truncf %12 : vector<128x16xf32> to vector<128x16xbf16>
    %c0_9 = arith.constant 0 : index
    %c0_10 = arith.constant 0 : index
    %14 = vector.load %arg6[%c0_9, %c0_10] : memref<128x16xbf16, #tpu.memory_space<vmem>>, vector<128x16xbf16>
    tpu.vector_store %arg6[%c0_9, %c0_10], %13 {strides = array<i32>} : memref<128x16xbf16, #tpu.memory_space<vmem>>, vector<128x16xbf16>,
    %15 = vector.extract_strided_slice %5 {offsets = [0, 48], sizes = [128, 16], strides = [1, 1]} : vector<128x96xf32> to vector<128x16xf32>
    %16 = arith.truncf %15 : vector<128x16xf32> to vector<128x16xbf16>
    %c0_11 = arith.constant 0 : index
    %c0_12 = arith.constant 0 : index
    %17 = vector.load %arg7[%c0_11, %c0_12] : memref<128x16xbf16, #tpu.memory_space<vmem>>, vector<128x16xbf16>
    tpu.vector_store %arg7[%c0_11, %c0_12], %16 {strides = array<i32>} : memref<128x16xbf16, #tpu.memory_space<vmem>>, vector<128x16xbf16>,
    %18 = vector.extract_strided_slice %5 {offsets = [0, 64], sizes = [128, 16], strides = [1, 1]} : vector<128x96xf32> to vector<128x16xf32>
    %19 = arith.truncf %18 : vector<128x16xf32> to vector<128x16xbf16>
    %c0_13 = arith.constant 0 : index
    %c0_14 = arith.constant 0 : index
    %20 = vector.load %arg8[%c0_13, %c0_14] : memref<128x16xbf16, #tpu.memory_space<vmem>>, vector<128x16xbf16>
    tpu.vector_store %arg8[%c0_13, %c0_14], %19 {strides = array<i32>} : memref<128x16xbf16, #tpu.memory_space<vmem>>, vector<128x16xbf16>,
    %21 = vector.extract_strided_slice %5 {offsets = [0, 80], sizes = [128, 16], strides = [1, 1]} : vector<128x96xf32> to vector<128x16xf32>
    %22 = arith.truncf %21 : vector<128x16xf32> to vector<128x16xbf16>
    %c0_15 = arith.constant 0 : index
    %c0_16 = arith.constant 0 : index
    %23 = vector.load %arg9[%c0_15, %c0_16] : memref<128x16xbf16, #tpu.memory_space<vmem>>, vector<128x16xbf16>
    tpu.vector_store %arg9[%c0_15, %c0_16], %22 {strides = array<i32>} : memref<128x16xbf16, #tpu.memory_space<vmem>>, vector<128x16xbf16>,
    return
  }
  func.func @transform_0(%arg0: i32) -> (i32, i32) {
    %c0_i32 = arith.constant 0 : i32
    %c0_i32_0 = arith.constant 0 : i32
    return %arg0, %c0_i32 : i32, i32
  }
  func.func @transform_1(%arg0: i32) -> (i32, i32) {
    %c0_i32 = arith.constant 0 : i32
    %c0_i32_0 = arith.constant 0 : i32
    %c0_i32_1 = arith.constant 0 : i32
    return %c0_i32, %c0_i32_0 : i32, i32
  }
  func.func @transform_2(%arg0: i32) -> (i32, i32) {
    %c0_i32 = arith.constant 0 : i32
    %c0_i32_0 = arith.constant 0 : i32
    %c0_i32_1 = arith.constant 0 : i32
    return %c0_i32, %c0_i32_0 : i32, i32
  }
  func.func @transform_3(%arg0: i32) -> (i32, i32) {
    %c0_i32 = arith.constant 0 : i32
    %c0_i32_0 = arith.constant 0 : i32
    return %arg0, %c0_i32 : i32, i32
  }
  func.func @transform_4(%arg0: i32) -> (i32, i32) {
    %c0_i32 = arith.constant 0 : i32
    %c0_i32_0 = arith.constant 0 : i32
    return %arg0, %c0_i32 : i32, i32
  }
  func.func @transform_5(%arg0: i32) -> (i32, i32) {
    %c0_i32 = arith.constant 0 : i32
    %c0_i32_0 = arith.constant 0 : i32
    return %arg0, %c0_i32 : i32, i32
  }
  func.func @transform_6(%arg0: i32) -> (i32, i32) {
    %c0_i32 = arith.constant 0 : i32
    %c0_i32_0 = arith.constant 0 : i32
    return %arg0, %c0_i32 : i32, i32
  }
  func.func @transform_7(%arg0: i32) -> (i32, i32) {
    %c0_i32 = arith.constant 0 : i32
    %c0_i32_0 = arith.constant 0 : i32
    return %arg0, %c0_i32 : i32, i32
  }
  func.func @transform_8(%arg0: i32) -> (i32, i32) {
    %c0_i32 = arith.constant 0 : i32
    %c0_i32_0 = arith.constant 0 : i32
    return %arg0, %c0_i32 : i32, i32
  }
}

module attributes {stable_mosaic.version = 11 : i64} {
  func.func @kernel(%arg0: i32, %arg1: i32, %arg2: memref<1x2x8x8xbf16, #tpu.memory_space<vmem>>, %arg3: memref<1x2x64x8xbf16, #tpu.memory_space<vmem>>, %arg4: memref<1x2x64x8xbf16, #tpu.memory_space<vmem>>, %arg5: memref<1x8x16xf32, #tpu.memory_space<vmem>>, %arg6: memref<2x8x8xf32, #tpu.memory_space<vmem>>, %arg7: memref<2x8x1xf32, #tpu.memory_space<vmem>>, %arg8: memref<2x8x1xf32, #tpu.memory_space<vmem>>) attributes {dimension_semantics = [#tpu.dimension_semantics<parallel>, #tpu.dimension_semantics<arbitrary>], iteration_bounds = array<i64: 2, 1>, scalar_prefetch = 0 : i64, scratch_operands = 3 : i64, tpu.core_type = #tpu.core_type<tc>, window_params = [{transform_indices = @transform_0, window_bounds = array<i64: 1, 2, 8, 8>}, {transform_indices = @transform_1, window_bounds = array<i64: 1, 2, 64, 8>}, {transform_indices = @transform_2, window_bounds = array<i64: 1, 2, 64, 8>}, {transform_indices = @transform_3, window_bounds = array<i64: 1, 8, 16>}]} {
    %c0_i32 = arith.constant 0 : i32
    %0 = arith.cmpi eq, %arg1, %c0_i32 : i32
    %1 = arith.extui %0 : i1 to i32
    %c0_i32_0 = arith.constant 0 : i32
    %2 = arith.cmpi ne, %1, %c0_i32_0 : i32
    scf.if %2 {
      %cst_35 = arith.constant -1.000000e+30 : f32
      %36 = vector.broadcast %cst_35 : f32 to vector<2x8x1xf32>
      %c0_36 = arith.constant 0 : index
      %c0_37 = arith.constant 0 : index
      %c0_38 = arith.constant 0 : index
      %37 = vector.load %arg7[%c0_36, %c0_37, %c0_38] : memref<2x8x1xf32, #tpu.memory_space<vmem>>, vector<2x8x1xf32>
      tpu.vector_store %arg7[%c0_36, %c0_37, %c0_38], %36 {strides = array<i32>} : memref<2x8x1xf32, #tpu.memory_space<vmem>>, vector<2x8x1xf32>,
      %cst_39 = arith.constant 0.000000e+00 : f32
      %38 = vector.broadcast %cst_39 : f32 to vector<2x8x1xf32>
      %c0_40 = arith.constant 0 : index
      %c0_41 = arith.constant 0 : index
      %c0_42 = arith.constant 0 : index
      %39 = vector.load %arg8[%c0_40, %c0_41, %c0_42] : memref<2x8x1xf32, #tpu.memory_space<vmem>>, vector<2x8x1xf32>
      tpu.vector_store %arg8[%c0_40, %c0_41, %c0_42], %38 {strides = array<i32>} : memref<2x8x1xf32, #tpu.memory_space<vmem>>, vector<2x8x1xf32>,
      %cst_43 = arith.constant 0.000000e+00 : f32
      %40 = vector.broadcast %cst_43 : f32 to vector<2x8x8xf32>
      %c0_44 = arith.constant 0 : index
      %c0_45 = arith.constant 0 : index
      %c0_46 = arith.constant 0 : index
      %41 = vector.load %arg6[%c0_44, %c0_45, %c0_46] : memref<2x8x8xf32, #tpu.memory_space<vmem>>, vector<2x8x8xf32>
      tpu.vector_store %arg6[%c0_44, %c0_45, %c0_46], %40 {strides = array<i32>} : memref<2x8x8xf32, #tpu.memory_space<vmem>>, vector<2x8x8xf32>,
    } else {
    }
    %c0 = arith.constant 0 : index
    %c0_1 = arith.constant 0 : index
    %c0_2 = arith.constant 0 : index
    %c0_3 = arith.constant 0 : index
    %3 = vector.load %arg2[%c0, %c0_1, %c0_2, %c0_3] : memref<1x2x8x8xbf16, #tpu.memory_space<vmem>>, vector<1x2x8x8xbf16>
    %4 = vector.shape_cast %3 : vector<1x2x8x8xbf16> to vector<2x8x8xbf16>
    %c0_4 = arith.constant 0 : index
    %c0_5 = arith.constant 0 : index
    %c0_6 = arith.constant 0 : index
    %c0_7 = arith.constant 0 : index
    %5 = vector.load %arg3[%c0_4, %c0_5, %c0_6, %c0_7] : memref<1x2x64x8xbf16, #tpu.memory_space<vmem>>, vector<1x2x64x8xbf16>
    %6 = vector.shape_cast %5 : vector<1x2x64x8xbf16> to vector<2x64x8xbf16>
    %c0_8 = arith.constant 0 : index
    %c0_9 = arith.constant 0 : index
    %c0_10 = arith.constant 0 : index
    %c0_11 = arith.constant 0 : index
    %7 = vector.load %arg4[%c0_8, %c0_9, %c0_10, %c0_11] : memref<1x2x64x8xbf16, #tpu.memory_space<vmem>>, vector<1x2x64x8xbf16>
    %8 = vector.shape_cast %7 : vector<1x2x64x8xbf16> to vector<2x64x8xbf16>
    "tpu.trace_start"() <{level = 10 : i32, message = "hqd,hkd->hqk"}> : () -> ()
    %cst = arith.constant dense<0.000000e+00> : vector<2x8x64xf32>
    %9 = tpu.matmul %4, %6, %cst {dimension_numbers = #tpu.dot_dimension_numbers<[2], [2], [1], [1], [0, 0, 0, 1, 1, 1], [0], [0]>} : vector<2x8x8xbf16>, vector<2x64x8xbf16>, vector<2x8x64xf32> -> vector<2x8x64xf32>
    "tpu.trace_stop"() : () -> ()
    %c0_12 = arith.constant 0 : index
    %c0_13 = arith.constant 0 : index
    %c0_14 = arith.constant 0 : index
    %10 = vector.load %arg7[%c0_12, %c0_13, %c0_14] : memref<2x8x1xf32, #tpu.memory_space<vmem>>, vector<2x8x1xf32>
    %cst_15 = arith.constant dense<0xFF800000> : vector<2x8xf32>
    %11 = vector.multi_reduction <maximumf>, %9, %cst_15 [2] : vector<2x8x64xf32> to vector<2x8xf32>
    %12 = vector.shape_cast %11 : vector<2x8xf32> to vector<2x8x1xf32>
    %13 = arith.maximumf %10, %12 : vector<2x8x1xf32>
    %14 = arith.subf %10, %13 : vector<2x8x1xf32>
    %15 = math.exp %14 : vector<2x8x1xf32>
    %16 = vector.broadcast %13 : vector<2x8x1xf32> to vector<2x8x64xf32>
    %17 = arith.subf %9, %16 : vector<2x8x64xf32>
    %18 = math.exp %17 : vector<2x8x64xf32>
    %c0_16 = arith.constant 0 : index
    %c0_17 = arith.constant 0 : index
    %c0_18 = arith.constant 0 : index
    %19 = vector.load %arg7[%c0_16, %c0_17, %c0_18] : memref<2x8x1xf32, #tpu.memory_space<vmem>>, vector<2x8x1xf32>
    tpu.vector_store %arg7[%c0_16, %c0_17, %c0_18], %13 {strides = array<i32>} : memref<2x8x1xf32, #tpu.memory_space<vmem>>, vector<2x8x1xf32>,
    %c0_19 = arith.constant 0 : index
    %c0_20 = arith.constant 0 : index
    %c0_21 = arith.constant 0 : index
    %20 = vector.load %arg8[%c0_19, %c0_20, %c0_21] : memref<2x8x1xf32, #tpu.memory_space<vmem>>, vector<2x8x1xf32>
    %21 = arith.mulf %15, %20 : vector<2x8x1xf32>
    %cst_22 = arith.constant dense<0.000000e+00> : vector<2x8xf32>
    %22 = vector.multi_reduction <add>, %18, %cst_22 [2] : vector<2x8x64xf32> to vector<2x8xf32>
    %23 = vector.shape_cast %22 : vector<2x8xf32> to vector<2x8x1xf32>
    %24 = arith.addf %21, %23 : vector<2x8x1xf32>
    %c0_23 = arith.constant 0 : index
    %c0_24 = arith.constant 0 : index
    %c0_25 = arith.constant 0 : index
    %25 = vector.load %arg8[%c0_23, %c0_24, %c0_25] : memref<2x8x1xf32, #tpu.memory_space<vmem>>, vector<2x8x1xf32>
    tpu.vector_store %arg8[%c0_23, %c0_24, %c0_25], %24 {strides = array<i32>} : memref<2x8x1xf32, #tpu.memory_space<vmem>>, vector<2x8x1xf32>,
    %c0_26 = arith.constant 0 : index
    %c0_27 = arith.constant 0 : index
    %c0_28 = arith.constant 0 : index
    %26 = vector.load %arg6[%c0_26, %c0_27, %c0_28] : memref<2x8x8xf32, #tpu.memory_space<vmem>>, vector<2x8x8xf32>
    %27 = vector.broadcast %15 : vector<2x8x1xf32> to vector<2x8x8xf32>
    %28 = arith.mulf %27, %26 : vector<2x8x8xf32>
    %29 = arith.truncf %18 : vector<2x8x64xf32> to vector<2x8x64xbf16>
    "tpu.trace_start"() <{level = 10 : i32, message = "hqk,hkd->hqd"}> : () -> ()
    %cst_29 = arith.constant dense<0.000000e+00> : vector<2x8x8xf32>
    %30 = tpu.matmul %29, %8, %cst_29 {dimension_numbers = #tpu.dot_dimension_numbers<[2], [1], [1], [2], [0, 0, 0, 1, 1, 2], [0], [0]>} : vector<2x8x64xbf16>, vector<2x64x8xbf16>, vector<2x8x8xf32> -> vector<2x8x8xf32>
    "tpu.trace_stop"() : () -> ()
    %31 = arith.addf %28, %30 : vector<2x8x8xf32>
    %c0_30 = arith.constant 0 : index
    %c0_31 = arith.constant 0 : index
    %c0_32 = arith.constant 0 : index
    %32 = vector.load %arg6[%c0_30, %c0_31, %c0_32] : memref<2x8x8xf32, #tpu.memory_space<vmem>>, vector<2x8x8xf32>
    tpu.vector_store %arg6[%c0_30, %c0_31, %c0_32], %31 {strides = array<i32>} : memref<2x8x8xf32, #tpu.memory_space<vmem>>, vector<2x8x8xf32>,
    %c0_i32_33 = arith.constant 0 : i32
    %33 = arith.cmpi eq, %arg1, %c0_i32_33 : i32
    %34 = arith.extui %33 : i1 to i32
    %c0_i32_34 = arith.constant 0 : i32
    %35 = arith.cmpi ne, %34, %c0_i32_34 : i32
    scf.if %35 {
      %c0_35 = arith.constant 0 : index
      %c0_36 = arith.constant 0 : index
      %c0_37 = arith.constant 0 : index
      %36 = vector.load %arg8[%c0_35, %c0_36, %c0_37] : memref<2x8x1xf32, #tpu.memory_space<vmem>>, vector<2x8x1xf32>
      %37 = tpu.reciprocal %36 {approx = true} : vector<2x8x1xf32> -> vector<2x8x1xf32>
      %c0_38 = arith.constant 0 : index
      %c0_39 = arith.constant 0 : index
      %c0_40 = arith.constant 0 : index
      %38 = vector.load %arg6[%c0_38, %c0_39, %c0_40] : memref<2x8x8xf32, #tpu.memory_space<vmem>>, vector<1x8x8xf32>
      %39 = vector.shape_cast %38 : vector<1x8x8xf32> to vector<8x8xf32>
      %40 = vector.extract_strided_slice %37 {offsets = [0, 0, 0], sizes = [1, 8, 1], strides = [1, 1, 1]} : vector<2x8x1xf32> to vector<1x8x1xf32>
      %41 = vector.shape_cast %40 : vector<1x8x1xf32> to vector<8x1xf32>
      %42 = vector.broadcast %41 : vector<8x1xf32> to vector<8x8xf32>
      %43 = arith.mulf %39, %42 : vector<8x8xf32>
      %c1 = arith.constant 1 : index
      %c0_41 = arith.constant 0 : index
      %c0_42 = arith.constant 0 : index
      %44 = vector.load %arg6[%c1, %c0_41, %c0_42] : memref<2x8x8xf32, #tpu.memory_space<vmem>>, vector<1x8x8xf32>
      %45 = vector.shape_cast %44 : vector<1x8x8xf32> to vector<8x8xf32>
      %46 = vector.extract_strided_slice %37 {offsets = [1, 0, 0], sizes = [1, 8, 1], strides = [1, 1, 1]} : vector<2x8x1xf32> to vector<1x8x1xf32>
      %47 = vector.shape_cast %46 : vector<1x8x1xf32> to vector<8x1xf32>
      %48 = vector.broadcast %47 : vector<8x1xf32> to vector<8x8xf32>
      %49 = arith.mulf %45, %48 : vector<8x8xf32>
      %50 = tpu.concatenate %43, %49 in 1 : vector<8x8xf32>, vector<8x8xf32> -> vector<8x16xf32>
      %c0_43 = arith.constant 0 : index
      %c0_44 = arith.constant 0 : index
      %c0_45 = arith.constant 0 : index
      %51 = vector.load %arg5[%c0_43, %c0_44, %c0_45] : memref<1x8x16xf32, #tpu.memory_space<vmem>>, vector<1x8x16xf32>
      %52 = vector.shape_cast %51 : vector<1x8x16xf32> to vector<8x16xf32>
      %53 = vector.shape_cast %50 : vector<8x16xf32> to vector<1x8x16xf32>
      tpu.vector_store %arg5[%c0_43, %c0_44, %c0_45], %53 {strides = array<i32>} : memref<1x8x16xf32, #tpu.memory_space<vmem>>, vector<1x8x16xf32>,
    } else {
    }
    return
  }
  func.func @transform_0(%arg0: i32, %arg1: i32) -> (i32, i32, i32, i32) {
    %c0_i32 = arith.constant 0 : i32
    %c0_i32_0 = arith.constant 0 : i32
    %c0_i32_1 = arith.constant 0 : i32
    %c0_i32_2 = arith.constant 0 : i32
    return %arg0, %c0_i32, %c0_i32_0, %c0_i32_1 : i32, i32, i32, i32
  }
  func.func @transform_1(%arg0: i32, %arg1: i32) -> (i32, i32, i32, i32) {
    %c0_i32 = arith.constant 0 : i32
    %c0_i32_0 = arith.constant 0 : i32
    %c0_i32_1 = arith.constant 0 : i32
    return %arg0, %c0_i32, %arg1, %c0_i32_0 : i32, i32, i32, i32
  }
  func.func @transform_2(%arg0: i32, %arg1: i32) -> (i32, i32, i32, i32) {
    %c0_i32 = arith.constant 0 : i32
    %c0_i32_0 = arith.constant 0 : i32
    %c0_i32_1 = arith.constant 0 : i32
    return %arg0, %c0_i32, %arg1, %c0_i32_0 : i32, i32, i32, i32
  }
  func.func @transform_3(%arg0: i32, %arg1: i32) -> (i32, i32, i32) {
    %c0_i32 = arith.constant 0 : i32
    %c0_i32_0 = arith.constant 0 : i32
    %c0_i32_1 = arith.constant 0 : i32
    return %arg0, %c0_i32, %c0_i32_0 : i32, i32, i32
  }
}

module attributes {stable_mosaic.version = 11 : i64} {
  func.func @kernel(%arg0: i32, %arg1: i32, %arg2: i32, %arg3: memref<1x2x8x8xbf16, #tpu.memory_space<vmem>>, %arg4: memref<1x2x8x8xbf16, #tpu.memory_space<vmem>>, %arg5: memref<1x2x8x8xbf16, #tpu.memory_space<vmem>>, %arg6: memref<1x2x8x8xbf16, #tpu.memory_space<vmem>>, %arg7: memref<1x2x8x8xbf16, #tpu.memory_space<vmem>>, %arg8: memref<1x8x16xf32, #tpu.memory_space<vmem>>, %arg9: memref<1x8xi32, #tpu.memory_space<vmem>>, %arg10: memref<1x8x16xf32, #tpu.memory_space<vmem>>, %arg11: memref<2x8x8xf32, #tpu.memory_space<vmem>>, %arg12: memref<2x8x1xf32, #tpu.memory_space<vmem>>, %arg13: memref<2x8x1xf32, #tpu.memory_space<vmem>>) attributes {dimension_semantics = [#tpu.dimension_semantics<parallel>, #tpu.dimension_semantics<parallel>, #tpu.dimension_semantics<arbitrary>], iteration_bounds = array<i64: 2, 8, 3>, scalar_prefetch = 0 : i64, scratch_operands = 3 : i64, tpu.core_type = #tpu.core_type<tc>, window_params = [{transform_indices = @transform_0, window_bounds = array<i64: 1, 2, 8, 8>}, {transform_indices = @transform_1, window_bounds = array<i64: 1, 2, 8, 8>}, {transform_indices = @transform_2, window_bounds = array<i64: 1, 2, 8, 8>}, {transform_indices = @transform_3, window_bounds = array<i64: 1, 2, 8, 8>}, {transform_indices = @transform_4, window_bounds = array<i64: 1, 2, 8, 8>}, {transform_indices = @transform_5, window_bounds = array<i64: 1, 8, 16>}, {pipeline_mode = #tpu.pipeline_mode<synchronous>, transform_indices = @transform_6, window_bounds = array<i64: 1, 8>}, {transform_indices = @transform_7, window_bounds = array<i64: 1, 8, 16>}]} {
    %c0 = arith.constant 0 : index
    %c0_0 = arith.constant 0 : index
    %c0_1 = arith.constant 0 : index
    %c0_2 = arith.constant 0 : index
    %0 = vector.load %arg3[%c0, %c0_0, %c0_1, %c0_2] : memref<1x2x8x8xbf16, #tpu.memory_space<vmem>>, vector<1x2x8x8xbf16>
    %1 = vector.shape_cast %0 : vector<1x2x8x8xbf16> to vector<2x8x8xbf16>
    %c0_i32 = arith.constant 0 : i32
    %2 = arith.cmpi eq, %arg2, %c0_i32 : i32
    %3 = arith.extui %2 : i1 to i32
    %c0_i32_3 = arith.constant 0 : i32
    %4 = arith.cmpi ne, %3, %c0_i32_3 : i32
    scf.if %4 {
      %c0_16 = arith.constant 0 : index
      %c0_17 = arith.constant 0 : index
      %c0_18 = arith.constant 0 : index
      %c0_19 = arith.constant 0 : index
      %27 = vector.load %arg6[%c0_16, %c0_17, %c0_18, %c0_19] : memref<1x2x8x8xbf16, #tpu.memory_space<vmem>>, vector<1x2x8x8xbf16>
      %28 = vector.shape_cast %27 : vector<1x2x8x8xbf16> to vector<2x8x8xbf16>
      %c0_20 = arith.constant 0 : index
      %c0_21 = arith.constant 0 : index
      %c0_22 = arith.constant 0 : index
      %c0_23 = arith.constant 0 : index
      %29 = vector.load %arg7[%c0_20, %c0_21, %c0_22, %c0_23] : memref<1x2x8x8xbf16, #tpu.memory_space<vmem>>, vector<1x2x8x8xbf16>
      %30 = vector.shape_cast %29 : vector<1x2x8x8xbf16> to vector<2x8x8xbf16>
      "tpu.trace_start"() <{level = 10 : i32, message = "hqd,hkd->hqk"}> : () -> ()
      %cst = arith.constant dense<0.000000e+00> : vector<2x8x8xf32>
      %31 = tpu.matmul %1, %28, %cst {dimension_numbers = #tpu.dot_dimension_numbers<[2], [2], [1], [1], [0, 0, 0, 1, 1, 1], [0], [0]>} : vector<2x8x8xbf16>, vector<2x8x8xbf16>, vector<2x8x8xf32> -> vector<2x8x8xf32>
      "tpu.trace_stop"() : () -> ()
      %cst_24 = arith.constant dense<0xFF800000> : vector<2x8xf32>
      %32 = vector.multi_reduction <maximumf>, %31, %cst_24 [2] : vector<2x8x8xf32> to vector<2x8xf32>
      %33 = vector.shape_cast %32 : vector<2x8xf32> to vector<2x8x1xf32>
      %34 = vector.broadcast %33 : vector<2x8x1xf32> to vector<2x8x8xf32>
      %35 = arith.subf %31, %34 : vector<2x8x8xf32>
      %36 = math.exp %35 : vector<2x8x8xf32>
      %c0_25 = arith.constant 0 : index
      %c0_26 = arith.constant 0 : index
      %c0_27 = arith.constant 0 : index
      %37 = vector.load %arg12[%c0_25, %c0_26, %c0_27] : memref<2x8x1xf32, #tpu.memory_space<vmem>>, vector<2x8x1xf32>
      tpu.vector_store %arg12[%c0_25, %c0_26, %c0_27], %33 {strides = array<i32>} : memref<2x8x1xf32, #tpu.memory_space<vmem>>, vector<2x8x1xf32>,
      %cst_28 = arith.constant dense<0.000000e+00> : vector<2x8xf32>
      %38 = vector.multi_reduction <add>, %36, %cst_28 [2] : vector<2x8x8xf32> to vector<2x8xf32>
      %39 = vector.shape_cast %38 : vector<2x8xf32> to vector<2x8x1xf32>
      %c0_29 = arith.constant 0 : index
      %c0_30 = arith.constant 0 : index
      %c0_31 = arith.constant 0 : index
      %40 = vector.load %arg13[%c0_29, %c0_30, %c0_31] : memref<2x8x1xf32, #tpu.memory_space<vmem>>, vector<2x8x1xf32>
      tpu.vector_store %arg13[%c0_29, %c0_30, %c0_31], %39 {strides = array<i32>} : memref<2x8x1xf32, #tpu.memory_space<vmem>>, vector<2x8x1xf32>,
      %41 = arith.truncf %36 : vector<2x8x8xf32> to vector<2x8x8xbf16>
      "tpu.trace_start"() <{level = 10 : i32, message = "hqk,hkd->hqd"}> : () -> ()
      %cst_32 = arith.constant dense<0.000000e+00> : vector<2x8x8xf32>
      %42 = tpu.matmul %41, %30, %cst_32 {dimension_numbers = #tpu.dot_dimension_numbers<[2], [1], [1], [2], [0, 0, 0, 1, 1, 2], [0], [0]>} : vector<2x8x8xbf16>, vector<2x8x8xbf16>, vector<2x8x8xf32> -> vector<2x8x8xf32>
      "tpu.trace_stop"() : () -> ()
      %c0_33 = arith.constant 0 : index
      %c0_34 = arith.constant 0 : index
      %c0_35 = arith.constant 0 : index
      %43 = vector.load %arg11[%c0_33, %c0_34, %c0_35] : memref<2x8x8xf32, #tpu.memory_space<vmem>>, vector<2x8x8xf32>
      tpu.vector_store %arg11[%c0_33, %c0_34, %c0_35], %42 {strides = array<i32>} : memref<2x8x8xf32, #tpu.memory_space<vmem>>, vector<2x8x8xf32>,
    } else {
    }
    %c1_i32 = arith.constant 1 : i32
    %5 = arith.subi %arg1, %c1_i32 : i32
    %c5_i32 = arith.constant 5 : i32
    %6 = arith.minsi %5, %c5_i32 : i32
    %c0_i32_4 = arith.constant 0 : i32
    %7 = arith.maxsi %6, %c0_i32_4 : i32
    %8 = arith.addi %7, %arg2 : i32
    %c1_i32_5 = arith.constant 1 : i32
    %9 = arith.addi %8, %c1_i32_5 : i32
    %c8_i32 = arith.constant 8 : i32
    %10 = arith.muli %9, %c8_i32 : i32
    %c1_i32_6 = arith.constant 1 : i32
    %11 = arith.subi %10, %c1_i32_6 : i32
    %c8_i32_7 = arith.constant 8 : i32
    %12 = arith.muli %arg1, %c8_i32_7 : i32
    %c8_i32_8 = arith.constant 8 : i32
    %13 = arith.subi %12, %c8_i32_8 : i32
    %14 = arith.cmpi sge, %11, %13 : i32
    %c8_i32_9 = arith.constant 8 : i32
    %15 = arith.muli %8, %c8_i32_9 : i32
    %c8_i32_10 = arith.constant 8 : i32
    %16 = arith.muli %arg1, %c8_i32_10 : i32
    %c8_i32_11 = arith.constant 8 : i32
    %17 = arith.addi %16, %c8_i32_11 : i32
    %c1_i32_12 = arith.constant 1 : i32
    %18 = arith.subi %17, %c1_i32_12 : i32
    %c8_i32_13 = arith.constant 8 : i32
    %19 = arith.addi %18, %c8_i32_13 : i32
    %20 = arith.cmpi sle, %15, %19 : i32
    %21 = arith.andi %14, %20 : i1
    %22 = arith.extui %21 : i1 to i32
    %c0_i32_14 = arith.constant 0 : i32
    %23 = arith.cmpi ne, %22, %c0_i32_14 : i32
    scf.if %23 {
      %c0_16 = arith.constant 0 : index
      %c0_17 = arith.constant 0 : index
      %c0_18 = arith.constant 0 : index
      %c0_19 = arith.constant 0 : index
      %27 = vector.load %arg4[%c0_16, %c0_17, %c0_18, %c0_19] : memref<1x2x8x8xbf16, #tpu.memory_space<vmem>>, vector<1x2x8x8xbf16>
      %28 = vector.shape_cast %27 : vector<1x2x8x8xbf16> to vector<2x8x8xbf16>
      %c0_20 = arith.constant 0 : index
      %c0_21 = arith.constant 0 : index
      %c0_22 = arith.constant 0 : index
      %c0_23 = arith.constant 0 : index
      %29 = vector.load %arg5[%c0_20, %c0_21, %c0_22, %c0_23] : memref<1x2x8x8xbf16, #tpu.memory_space<vmem>>, vector<1x2x8x8xbf16>
      %30 = vector.shape_cast %29 : vector<1x2x8x8xbf16> to vector<2x8x8xbf16>
      "tpu.trace_start"() <{level = 10 : i32, message = "hqd,hkd->hqk"}> : () -> ()
      %cst = arith.constant dense<0.000000e+00> : vector<2x8x8xf32>
      %31 = tpu.matmul %1, %28, %cst {dimension_numbers = #tpu.dot_dimension_numbers<[2], [2], [1], [1], [0, 0, 0, 1, 1, 1], [0], [0]>} : vector<2x8x8xbf16>, vector<2x8x8xbf16>, vector<2x8x8xf32> -> vector<2x8x8xf32>
      "tpu.trace_stop"() : () -> ()
      %c8_i32_24 = arith.constant 8 : i32
      %32 = arith.muli %arg1, %c8_i32_24 : i32
      %33 = tpu.iota {dimensions = array<i32: 0>} : vector<8x8xi32>
      %34 = vector.broadcast %32 : i32 to vector<8x8xi32>
      %35 = arith.addi %34, %33 : vector<8x8xi32>
      %c8_i32_25 = arith.constant 8 : i32
      %36 = arith.muli %8, %c8_i32_25 : i32
      %37 = tpu.iota {dimensions = array<i32: 1>} : vector<8x8xi32>
      %38 = vector.broadcast %36 : i32 to vector<8x8xi32>
      %39 = arith.addi %38, %37 : vector<8x8xi32>
      %40 = arith.subi %35, %39 : vector<8x8xi32>
      %41 = math.absi %40 : vector<8x8xi32>
      %c8_i32_26 = arith.constant 8 : i32
      %42 = vector.broadcast %c8_i32_26 : i32 to vector<8x8xi32>
      %43 = arith.cmpi sle, %41, %42 : vector<8x8xi32>
      %44 = vector.shape_cast %43 : vector<8x8xi1> to vector<1x8x8xi1>
      %cst_27 = arith.constant -1.000000e+30 : f32
      %45 = vector.shape_cast %44 : vector<1x8x8xi1> to vector<1x8x8xi1>
      %46 = vector.broadcast %45 : vector<1x8x8xi1> to vector<2x8x8xi1>
      %47 = vector.broadcast %cst_27 : f32 to vector<2x8x8xf32>
      %48 = arith.select %46, %31, %47 : vector<2x8x8xi1>, vector<2x8x8xf32>
      %c0_28 = arith.constant 0 : index
      %c0_29 = arith.constant 0 : index
      %c0_30 = arith.constant 0 : index
      %49 = vector.load %arg12[%c0_28, %c0_29, %c0_30] : memref<2x8x1xf32, #tpu.memory_space<vmem>>, vector<2x8x1xf32>
      %cst_31 = arith.constant dense<0xFF800000> : vector<2x8xf32>
      %50 = vector.multi_reduction <maximumf>, %48, %cst_31 [2] : vector<2x8x8xf32> to vector<2x8xf32>
      %51 = vector.shape_cast %50 : vector<2x8xf32> to vector<2x8x1xf32>
      %52 = arith.maximumf %49, %51 : vector<2x8x1xf32>
      %53 = arith.subf %49, %52 : vector<2x8x1xf32>
      %54 = math.exp %53 : vector<2x8x1xf32>
      %55 = vector.broadcast %52 : vector<2x8x1xf32> to vector<2x8x8xf32>
      %56 = arith.subf %48, %55 : vector<2x8x8xf32>
      %57 = math.exp %56 : vector<2x8x8xf32>
      %c0_32 = arith.constant 0 : index
      %c0_33 = arith.constant 0 : index
      %c0_34 = arith.constant 0 : index
      %58 = vector.load %arg12[%c0_32, %c0_33, %c0_34] : memref<2x8x1xf32, #tpu.memory_space<vmem>>, vector<2x8x1xf32>
      tpu.vector_store %arg12[%c0_32, %c0_33, %c0_34], %52 {strides = array<i32>} : memref<2x8x1xf32, #tpu.memory_space<vmem>>, vector<2x8x1xf32>,
      %c0_35 = arith.constant 0 : index
      %c0_36 = arith.constant 0 : index
      %c0_37 = arith.constant 0 : index
      %59 = vector.load %arg13[%c0_35, %c0_36, %c0_37] : memref<2x8x1xf32, #tpu.memory_space<vmem>>, vector<2x8x1xf32>
      %60 = arith.mulf %54, %59 : vector<2x8x1xf32>
      %cst_38 = arith.constant dense<0.000000e+00> : vector<2x8xf32>
      %61 = vector.multi_reduction <add>, %57, %cst_38 [2] : vector<2x8x8xf32> to vector<2x8xf32>
      %62 = vector.shape_cast %61 : vector<2x8xf32> to vector<2x8x1xf32>
      %63 = arith.addf %60, %62 : vector<2x8x1xf32>
      %c0_39 = arith.constant 0 : index
      %c0_40 = arith.constant 0 : index
      %c0_41 = arith.constant 0 : index
      %64 = vector.load %arg13[%c0_39, %c0_40, %c0_41] : memref<2x8x1xf32, #tpu.memory_space<vmem>>, vector<2x8x1xf32>
      tpu.vector_store %arg13[%c0_39, %c0_40, %c0_41], %63 {strides = array<i32>} : memref<2x8x1xf32, #tpu.memory_space<vmem>>, vector<2x8x1xf32>,
      %c0_42 = arith.constant 0 : index
      %c0_43 = arith.constant 0 : index
      %c0_44 = arith.constant 0 : index
      %65 = vector.load %arg11[%c0_42, %c0_43, %c0_44] : memref<2x8x8xf32, #tpu.memory_space<vmem>>, vector<2x8x8xf32>
      %66 = vector.broadcast %54 : vector<2x8x1xf32> to vector<2x8x8xf32>
      %67 = arith.mulf %66, %65 : vector<2x8x8xf32>
      %68 = arith.truncf %57 : vector<2x8x8xf32> to vector<2x8x8xbf16>
      "tpu.trace_start"() <{level = 10 : i32, message = "hqk,hkd->hqd"}> : () -> ()
      %cst_45 = arith.constant dense<0.000000e+00> : vector<2x8x8xf32>
      %69 = tpu.matmul %68, %30, %cst_45 {dimension_numbers = #tpu.dot_dimension_numbers<[2], [1], [1], [2], [0, 0, 0, 1, 1, 2], [0], [0]>} : vector<2x8x8xbf16>, vector<2x8x8xbf16>, vector<2x8x8xf32> -> vector<2x8x8xf32>
      "tpu.trace_stop"() : () -> ()
      %70 = arith.addf %67, %69 : vector<2x8x8xf32>
      %c0_46 = arith.constant 0 : index
      %c0_47 = arith.constant 0 : index
      %c0_48 = arith.constant 0 : index
      %71 = vector.load %arg11[%c0_46, %c0_47, %c0_48] : memref<2x8x8xf32, #tpu.memory_space<vmem>>, vector<2x8x8xf32>
      tpu.vector_store %arg11[%c0_46, %c0_47, %c0_48], %70 {strides = array<i32>} : memref<2x8x8xf32, #tpu.memory_space<vmem>>, vector<2x8x8xf32>,
    } else {
    }
    %c2_i32 = arith.constant 2 : i32
    %24 = arith.cmpi eq, %arg2, %c2_i32 : i32
    %25 = arith.extui %24 : i1 to i32
    %c0_i32_15 = arith.constant 0 : i32
    %26 = arith.cmpi ne, %25, %c0_i32_15 : i32
    scf.if %26 {
      %c0_16 = arith.constant 0 : index
      %c0_17 = arith.constant 0 : index
      %c0_18 = arith.constant 0 : index
      %27 = vector.load %arg13[%c0_16, %c0_17, %c0_18] : memref<2x8x1xf32, #tpu.memory_space<vmem>>, vector<2x8x1xf32>
      %28 = tpu.reciprocal %27 {approx = true} : vector<2x8x1xf32> -> vector<2x8x1xf32>
      %c0_19 = arith.constant 0 : index
      %c0_20 = arith.constant 0 : index
      %c0_21 = arith.constant 0 : index
      %29 = vector.load %arg11[%c0_19, %c0_20, %c0_21] : memref<2x8x8xf32, #tpu.memory_space<vmem>>, vector<1x8x8xf32>
      %30 = vector.shape_cast %29 : vector<1x8x8xf32> to vector<8x8xf32>
      %31 = vector.extract_strided_slice %28 {offsets = [0, 0, 0], sizes = [1, 8, 1], strides = [1, 1, 1]} : vector<2x8x1xf32> to vector<1x8x1xf32>
      %32 = vector.shape_cast %31 : vector<1x8x1xf32> to vector<8x1xf32>
      %33 = vector.broadcast %32 : vector<8x1xf32> to vector<8x8xf32>
      %34 = arith.mulf %30, %33 : vector<8x8xf32>
      %c1 = arith.constant 1 : index
      %c0_22 = arith.constant 0 : index
      %c0_23 = arith.constant 0 : index
      %35 = vector.load %arg11[%c1, %c0_22, %c0_23] : memref<2x8x8xf32, #tpu.memory_space<vmem>>, vector<1x8x8xf32>
      %36 = vector.shape_cast %35 : vector<1x8x8xf32> to vector<8x8xf32>
      %37 = vector.extract_strided_slice %28 {offsets = [1, 0, 0], sizes = [1, 8, 1], strides = [1, 1, 1]} : vector<2x8x1xf32> to vector<1x8x1xf32>
      %38 = vector.shape_cast %37 : vector<1x8x1xf32> to vector<8x1xf32>
      %39 = vector.broadcast %38 : vector<8x1xf32> to vector<8x8xf32>
      %40 = arith.mulf %36, %39 : vector<8x8xf32>
      %41 = tpu.concatenate %34, %40 in 1 : vector<8x8xf32>, vector<8x8xf32> -> vector<8x16xf32>
      %c8_i32_24 = arith.constant 8 : i32
      %42 = arith.muli %arg1, %c8_i32_24 : i32
      %43 = tpu.iota {dimensions = array<i32: 0>} : vector<8x1xi32>
      %44 = vector.broadcast %42 : i32 to vector<8x1xi32>
      %45 = arith.addi %44, %43 : vector<8x1xi32>
      %c0_25 = arith.constant 0 : index
      %c0_26 = arith.constant 0 : index
      %46 = vector.load %arg9[%c0_25, %c0_26] : memref<1x8xi32, #tpu.memory_space<vmem>>, vector<1x8xi32>
      %47 = vector.broadcast %45 : vector<8x1xi32> to vector<8x8xi32>
      %48 = vector.broadcast %46 : vector<1x8xi32> to vector<8x8xi32>
      %49 = arith.cmpi eq, %47, %48 : vector<8x8xi32>
      %50 = arith.extui %49 : vector<8x8xi1> to vector<8x8xi32>
      %51 = arith.sitofp %50 : vector<8x8xi32> to vector<8x8xf32>
      %cst = arith.constant dense<0.000000e+00> : vector<8xf32>
      %52 = vector.multi_reduction <add>, %51, %cst [1] : vector<8x8xf32> to vector<8xf32>
      %53 = vector.shape_cast %52 : vector<8xf32> to vector<8x1xf32>
      %cst_27 = arith.constant 0.000000e+00 : f32
      %54 = vector.broadcast %cst_27 : f32 to vector<8x1xf32>
      %55 = arith.cmpf ogt, %53, %54 : vector<8x1xf32>
      %c0_28 = arith.constant 0 : index
      %c0_29 = arith.constant 0 : index
      %c0_30 = arith.constant 0 : index
      %56 = vector.load %arg8[%c0_28, %c0_29, %c0_30] : memref<1x8x16xf32, #tpu.memory_space<vmem>>, vector<1x8x16xf32>
      %57 = vector.shape_cast %56 : vector<1x8x16xf32> to vector<8x16xf32>
      %cst_31 = arith.constant dense<0.000000e+00> : vector<8x16xf32>
      %58 = tpu.matmul %51, %57, %cst_31 {dimension_numbers = #tpu.dot_dimension_numbers<[1], [0], [0], [1], [0, 0, 1, 1], [], []>} : vector<8x8xf32>, vector<8x16xf32>, vector<8x16xf32> -> vector<8x16xf32>
      %59 = vector.shape_cast %55 : vector<8x1xi1> to vector<8x1xi1>
      %60 = vector.broadcast %59 : vector<8x1xi1> to vector<8x16xi1>
      %61 = arith.select %60, %58, %41 : vector<8x16xi1>, vector<8x16xf32>
      %c0_32 = arith.constant 0 : index
      %c0_33 = arith.constant 0 : index
      %c0_34 = arith.constant 0 : index
      %62 = vector.load %arg10[%c0_32, %c0_33, %c0_34] : memref<1x8x16xf32, #tpu.memory_space<vmem>>, vector<1x8x16xf32>
      %63 = vector.shape_cast %62 : vector<1x8x16xf32> to vector<8x16xf32>
      %64 = vector.shape_cast %61 : vector<8x16xf32> to vector<1x8x16xf32>
      tpu.vector_store %arg10[%c0_32, %c0_33, %c0_34], %64 {strides = array<i32>} : memref<1x8x16xf32, #tpu.memory_space<vmem>>, vector<1x8x16xf32>,
    } else {
    }
    return
  }
  func.func @transform_0(%arg0: i32, %arg1: i32, %arg2: i32) -> (i32, i32, i32, i32) {
    %c0_i32 = arith.constant 0 : i32
    %c0_i32_0 = arith.constant 0 : i32
    %c0_i32_1 = arith.constant 0 : i32
    return %arg0, %c0_i32, %arg1, %c0_i32_0 : i32, i32, i32, i32
  }
  func.func @transform_1(%arg0: i32, %arg1: i32, %arg2: i32) -> (i32, i32, i32, i32) {
    %c1_i32 = arith.constant 1 : i32
    %0 = arith.subi %arg1, %c1_i32 : i32
    %c5_i32 = arith.constant 5 : i32
    %1 = arith.minsi %0, %c5_i32 : i32
    %c0_i32 = arith.constant 0 : i32
    %2 = arith.maxsi %1, %c0_i32 : i32
    %3 = arith.addi %2, %arg2 : i32
    %c0_i32_0 = arith.constant 0 : i32
    %c0_i32_1 = arith.constant 0 : i32
    %c0_i32_2 = arith.constant 0 : i32
    return %arg0, %c0_i32_0, %3, %c0_i32_1 : i32, i32, i32, i32
  }
  func.func @transform_2(%arg0: i32, %arg1: i32, %arg2: i32) -> (i32, i32, i32, i32) {
    %c1_i32 = arith.constant 1 : i32
    %0 = arith.subi %arg1, %c1_i32 : i32
    %c5_i32 = arith.constant 5 : i32
    %1 = arith.minsi %0, %c5_i32 : i32
    %c0_i32 = arith.constant 0 : i32
    %2 = arith.maxsi %1, %c0_i32 : i32
    %3 = arith.addi %2, %arg2 : i32
    %c0_i32_0 = arith.constant 0 : i32
    %c0_i32_1 = arith.constant 0 : i32
    %c0_i32_2 = arith.constant 0 : i32
    return %arg0, %c0_i32_0, %3, %c0_i32_1 : i32, i32, i32, i32
  }
  func.func @transform_3(%arg0: i32, %arg1: i32, %arg2: i32) -> (i32, i32, i32, i32) {
    %c0_i32 = arith.constant 0 : i32
    %c0_i32_0 = arith.constant 0 : i32
    %c0_i32_1 = arith.constant 0 : i32
    %c0_i32_2 = arith.constant 0 : i32
    return %arg0, %c0_i32, %c0_i32_0, %c0_i32_1 : i32, i32, i32, i32
  }
  func.func @transform_4(%arg0: i32, %arg1: i32, %arg2: i32) -> (i32, i32, i32, i32) {
    %c0_i32 = arith.constant 0 : i32
    %c0_i32_0 = arith.constant 0 : i32
    %c0_i32_1 = arith.constant 0 : i32
    %c0_i32_2 = arith.constant 0 : i32
    return %arg0, %c0_i32, %c0_i32_0, %c0_i32_1 : i32, i32, i32, i32
  }
  func.func @transform_5(%arg0: i32, %arg1: i32, %arg2: i32) -> (i32, i32, i32) {
    %c0_i32 = arith.constant 0 : i32
    %c0_i32_0 = arith.constant 0 : i32
    %c0_i32_1 = arith.constant 0 : i32
    return %arg0, %c0_i32, %c0_i32_0 : i32, i32, i32
  }
  func.func @transform_6(%arg0: i32, %arg1: i32, %arg2: i32) -> (i32, i32) {
    %c0_i32 = arith.constant 0 : i32
    %c0_i32_0 = arith.constant 0 : i32
    %c0_i32_1 = arith.constant 0 : i32
    return %c0_i32, %c0_i32_0 : i32, i32
  }
  func.func @transform_7(%arg0: i32, %arg1: i32, %arg2: i32) -> (i32, i32, i32) {
    %c0_i32 = arith.constant 0 : i32
    %c0_i32_0 = arith.constant 0 : i32
    return %arg0, %arg1, %c0_i32 : i32, i32, i32
  }
}

</mosaic_0001>

<bundles_post_ra>
// kernel: fwd.3
= control target key start
LH: loop header
LB: loop body
LE: loop exit
PB: predicated region body
PF: predicated region fallthrough
CT: control target
= control target key end

     0   :  { %vm92_vm0 = vcmask 130048   ;;  %vm278_vm1 = vcmask 125952   ;;  %s732_s26 = smov 112   ;;  %s733_s16 = smov 96   ;;  %s1412_s1 = inlined_call_operand.vmem [shape: bf16[16,96], index: 1, kind: input, shape index: {}]   ;;  %s1413_s0 = inlined_call_operand.vmem [shape: bf16[128,16], index: 0, kind: input, shape index: {}]   ;;  %s1414_s2 = inlined_call_operand.vmem [shape: f32[1,96], index: 2, kind: input, shape index: {}]   ;;  %s1415_s3 = inlined_call_operand.vmem [shape: bf16[128,16], index: 3, kind: output, shape index: {0}]   ;;  %s1416_s4 = inlined_call_operand.vmem [shape: bf16[128,16], index: 4, kind: output, shape index: {1}]   ;;  %s1417_s5 = inlined_call_operand.vmem [shape: bf16[128,16], index: 5, kind: output, shape index: {2}]   ;;  %s1418_s6 = inlined_call_operand.vmem [shape: bf16[128,16], index: 6, kind: output, shape index: {3}]   ;;  %s1419_s7 = inlined_call_operand.vmem [shape: bf16[128,16], index: 7, kind: output, shape index: {4}]   ;;  %s1420_s8 = inlined_call_operand.vmem [shape: bf16[128,16], index: 8, kind: output, shape index: {5}]  }
   0x1   :  { %v723_v0 = vld [vmem:[%s1412_s1] sm:$0xff]   ;;  %v726_v3 = vld [vmem:[%s1413_s0 + $0x8] sm:$0xff]   ;;  %v728_v5 = vld [vmem:[%s1413_s0 + $0x10] sm:$0xff]   ;;  %s734_s10 = smov 80   ;;  %s735_s11 = smov 64  }
   0x2   :  { %v724_v1 = vld [vmem:[%s1413_s0] sm:$0xff]   ;;  %698 = vmatprep.subr.bf16.mxu0 %v723_v0  ;;  %716 = vmatprep.subr.bf16.mxu1 %v723_v0  ;;  %v727_v4 = vld [vmem:[%s1413_s0 + $0x28] sm:$0xff]   ;;  %v730_v6 = vld [vmem:[%s1413_s0 + $0x30] sm:$0xff]  }
   0x3   :  { %v725_v2 = vld [vmem:[%s1413_s0 + $0x20] sm:$0xff]   ;;  %699 = vmatpush3.bf16.msra.mxu0 %v723_v0  ;;  %717 = vmatpush3.bf16.msra.mxu1 %v723_v0  ;;  %v729_v7 = vld [vmem:[%s1413_s0 + $0x18] sm:$0xff]  }
   0x4   :  { %700 = vmatprep.mubr.msk.bf16.mxu0 %vm92_vm0, %v724_v1  ;;  %708 = vmatprep.mubr.msk.bf16.mxu1 %vm92_vm0, %v725_v2  ;;  %v731_v8 = vld [vmem:[%s1413_s0 + $0x38] sm:$0xff]   ;;  %v639_v9 = vld [vmem:[%s1414_s2] ss:$0 sm:$0xff] }
   0x6   :  { %701 = vmatmul.mubr.msk.bf16.vlgmr.msra.gmra.mrb[0].mxu0 %vm92_vm0, %v726_v3  ;;  %709 = vmatmul.mubr.msk.bf16.vlgmr.msra.gmra.mrb[0].mxu1 %vm92_vm0, %v727_v4 }
   0x7   :  { %704 = vmatprep.mubr.msk.bf16.mxu0 %vm92_vm0, %v728_v5  ;;  %712 = vmatprep.mubr.msk.bf16.mxu1 %vm92_vm0, %v730_v6 }
   0xe   :  { %705 = vmatmul.mubr.msk.bf16.gmra.mrb[4].mxu0 %vm92_vm0, %v729_v7  ;;  %713 = vmatmul.mubr.msk.bf16.gmra.mrb[4].mxu1 %vm92_vm0, %v731_v8 }
  0xd9   :  { %v702_v10 = vpop.f32.mrb[0].mxu0  ;;  %v710_v11 = vpop.f32.mrb[0].mxu1 }
  0xda   :  { %v160_v12 = vadd.f32 %v702_v10, %v639_v9  ;;  %v192_v13 = vadd.f32 %v710_v11, %v639_v9  ;;  %v151_v14 = vpop.f32.mrb[1].mxu0  ;;  %v183_v15 = vpop.f32.mrb[1].mxu1 }
  0xdb   :  { %v152_v16 = vadd.f32 %v639_v9, %v151_v14  ;;  %v184_v17 = vadd.f32 %v639_v9, %v183_v15  ;;  %v703_v18 = vpop.f32.mrb[2].mxu0  ;;  %v711_v19 = vpop.f32.mrb[2].mxu1 }
  0xdc   :  { %v820_v20 = vpack.c.bf16 %v160_v12, %v160_v12  ;;  %v822_v21 = vpack.c.bf16 %v192_v13, %v192_v13  ;;  %v163_v22 = vadd.f32 %v703_v18, %v639_v9  ;;  %v195_v23 = vadd.f32 %v711_v19, %v639_v9  ;;  %v154_v24 = vpop.f32.mrb[3].mxu0  ;;  %v186_v25 = vpop.f32.mrb[3].mxu1 }
  0xdd   :  { %v824_v26 = vpack.c.bf16 %v152_v16, %v152_v16  ;;  %v826_v27 = vpack.c.bf16 %v184_v17, %v184_v17  ;;  %v155_v28 = vadd.f32 %v639_v9, %v154_v24  ;;  %v187_v29 = vadd.f32 %v639_v9, %v186_v25 }
  0xde   :  { %281 = vst.msk [vmem:[%s1415_s3 + $0x8] sm:$0xf] %vm278_vm1, %v820_v20  ;;  %289 = vst.msk [vmem:[%s1415_s3 + $0x28] sm:$0xf] %vm278_vm1, %v822_v21  ;;  %v838_v30 = vpack.c.bf16 %v163_v22, %v163_v22  ;;  %v840_v31 = vpack.c.bf16 %v195_v23, %v195_v23  ;;  %315 = vrot.lane.b32.xlu0 %v822_v21, %s732_s26  ;;  %299 = vrot.lane.b32.xlu1 %v820_v20, %s732_s26 }
  0xdf   :  { %279 = vst.msk [vmem:[%s1415_s3] sm:$0xf] %vm278_vm1, %v824_v26  ;;  %287 = vst.msk [vmem:[%s1415_s3 + $0x20] sm:$0xf] %vm278_vm1, %v826_v27  ;;  %v856_v32 = vpack.c.bf16 %v155_v28, %v155_v28  ;;  %v858_v33 = vpack.c.bf16 %v187_v29, %v187_v29 }
  0xe0   :  { %282 = vst.msk [vmem:[%s1415_s3 + $0xc] sm:$0xf] %vm278_vm1, %v838_v30  ;;  %290 = vst.msk [vmem:[%s1415_s3 + $0x2c] sm:$0xf] %vm278_vm1, %v840_v31 }
  0xe1   :  { %280 = vst.msk [vmem:[%s1415_s3 + $0x4] sm:$0xf] %vm278_vm1, %v856_v32  ;;  %288 = vst.msk [vmem:[%s1415_s3 + $0x24] sm:$0xf] %vm278_vm1, %v858_v33  ;;  %v706_v34 = vpop.f32.mrb[4].mxu0  ;;  %v714_v35 = vpop.f32.mrb[4].mxu1 }
  0xe2   :  { %363 = vrot.lane.b32.xlu0 %v820_v20, %s733_s16  ;;  %301 = vrot.lane.b32.xlu1 %v838_v30, %s732_s26  ;;  %v176_v36 = vadd.f32 %v706_v34, %v639_v9  ;;  %v167_v37 = vpop.f32.mrb[5].mxu0  ;;  %v208_v38 = vadd.f32 %v714_v35, %v639_v9  ;;  %v199_v39 = vpop.f32.mrb[5].mxu1 }
  0xe3   :  { %v168_v40 = vadd.f32 %v639_v9, %v167_v37  ;;  %v707_v41 = vpop.f32.mrb[6].mxu0  ;;  %v200_v42 = vadd.f32 %v639_v9, %v199_v39  ;;  %v715_v43 = vpop.f32.mrb[6].mxu1 }
  0xe4   :  { %v884_v44 = vpack.c.bf16 %v176_v36, %v176_v36  ;;  %v179_v45 = vadd.f32 %v707_v41, %v639_v9  ;;  %v170_v46 = vpop.f32.mrb[7].mxu0  ;;  %v886_v47 = vpack.c.bf16 %v208_v38, %v208_v38  ;;  %v211_v48 = vadd.f32 %v715_v43, %v639_v9  ;;  %v202_v49 = vpop.f32.mrb[7].mxu1 }
  0xe5   :  { %v888_v50 = vpack.c.bf16 %v168_v40, %v168_v40  ;;  %v171_v51 = vadd.f32 %v639_v9, %v170_v46  ;;  %v890_v52 = vpack.c.bf16 %v200_v42, %v200_v42  ;;  %v203_v53 = vadd.f32 %v639_v9, %v202_v49 }
  0xe6   :  { %379 = vrot.lane.b32.xlu0 %v822_v21, %s733_s16  ;;  %317 = vrot.lane.b32.xlu1 %v840_v31, %s732_s26  ;;  %285 = vst.msk [vmem:[%s1415_s3 + $0x18] sm:$0xf] %vm278_vm1, %v884_v44  ;;  %v901_v54 = vpack.c.bf16 %v179_v45, %v179_v45  ;;  %293 = vst.msk [vmem:[%s1415_s3 + $0x38] sm:$0xf] %vm278_vm1, %v886_v47  ;;  %v908_v55 = vpack.c.bf16 %v211_v48, %v211_v48 }
  0xe7   :  { %283 = vst.msk [vmem:[%s1415_s3 + $0x10] sm:$0xf] %vm278_vm1, %v888_v50  ;;  %v915_v56 = vpack.c.bf16 %v171_v51, %v171_v51  ;;  %291 = vst.msk [vmem:[%s1415_s3 + $0x30] sm:$0xf] %vm278_vm1, %v890_v52  ;;  %v922_v57 = vpack.c.bf16 %v203_v53, %v203_v53 }
  0xe8   :  { %286 = vst.msk [vmem:[%s1415_s3 + $0x1c] sm:$0xf] %vm278_vm1, %v901_v54  ;;  %294 = vst.msk [vmem:[%s1415_s3 + $0x3c] sm:$0xf] %vm278_vm1, %v908_v55 }
  0xe9   :  { %284 = vst.msk [vmem:[%s1415_s3 + $0x14] sm:$0xf] %vm278_vm1, %v915_v56  ;;  %292 = vst.msk [vmem:[%s1415_s3 + $0x34] sm:$0xf] %vm278_vm1, %v922_v57  ;;  %s736_s3 = smov 48  }
  0xea   :  { %427 = vrot.lane.b32.xlu0 %v820_v20, %s734_s10  ;;  %365 = vrot.lane.b32.xlu1 %v838_v30, %s733_s16 }
  0xee   :  { %443 = vrot.lane.b32.xlu0 %v822_v21, %s734_s10  ;;  %381 = vrot.lane.b32.xlu1 %v840_v31, %s733_s16 }
  0xf2   :  { %491 = vrot.lane.b32.xlu0 %v820_v20, %s735_s11  ;;  %429 = vrot.lane.b32.xlu1 %v838_v30, %s734_s10 }
  0xf6   :  { %507 = vrot.lane.b32.xlu0 %v822_v21, %s735_s11  ;;  %445 = vrot.lane.b32.xlu1 %v840_v31, %s734_s10 }
  0xfa   :  { %555 = vrot.lane.b32.xlu0 %v820_v20, %s736_s3  ;;  %493 = vrot.lane.b32.xlu1 %v838_v30, %s735_s11 }
  0xfe   :  { %571 = vrot.lane.b32.xlu0 %v822_v21, %s736_s3  ;;  %509 = vrot.lane.b32.xlu1 %v840_v31, %s735_s11 }
 0x102   :  { %557 = vrot.lane.b32.xlu1 %v838_v30, %s736_s3  ;;  %295 = vrot.lane.b32.xlu0 %v824_v26, %s732_s26 }
 0x106   :  { %573 = vrot.lane.b32.xlu1 %v840_v31, %s736_s3  ;;  %311 = vrot.lane.b32.xlu0 %v826_v27, %s732_s26 }
 0x10a   :  { %313 = vrot.lane.b32.xlu1 %v858_v33, %s732_s26  ;;  %359 = vrot.lane.b32.xlu0 %v824_v26, %s733_s16 }
 0x10e   :  { %361 = vrot.lane.b32.xlu1 %v856_v32, %s733_s16  ;;  %375 = vrot.lane.b32.xlu0 %v826_v27, %s733_s16 }
 0x112   :  { %377 = vrot.lane.b32.xlu1 %v858_v33, %s733_s16  ;;  %423 = vrot.lane.b32.xlu0 %v824_v26, %s734_s10 }
 0x116   :  { %425 = vrot.lane.b32.xlu1 %v856_v32, %s734_s10  ;;  %439 = vrot.lane.b32.xlu0 %v826_v27, %s734_s10 }
 0x11a   :  { %441 = vrot.lane.b32.xlu1 %v858_v33, %s734_s10  ;;  %487 = vrot.lane.b32.xlu0 %v824_v26, %s735_s11 }
 0x11e   :  { %489 = vrot.lane.b32.xlu1 %v856_v32, %s735_s11  ;;  %503 = vrot.lane.b32.xlu0 %v826_v27, %s735_s11 }
 0x122   :  { %505 = vrot.lane.b32.xlu1 %v858_v33, %s735_s11  ;;  %551 = vrot.lane.b32.xlu0 %v824_v26, %s736_s3 }
 0x126   :  { %553 = vrot.lane.b32.xlu1 %v856_v32, %s736_s3  ;;  %567 = vrot.lane.b32.xlu0 %v826_v27, %s736_s3 }
 0x12a   :  { %569 = vrot.lane.b32.xlu1 %v858_v33, %s736_s3  ;;  %297 = vrot.lane.b32.xlu0 %v856_v32, %s732_s26 }
 0x12e   :  { %309 = vrot.lane.b32.xlu1 %v901_v54, %s732_s26  ;;  %307 = vrot.lane.b32.xlu0 %v884_v44, %s732_s26 }
 0x132   :  { %325 = vrot.lane.b32.xlu1 %v908_v55, %s732_s26  ;;  %323 = vrot.lane.b32.xlu0 %v886_v47, %s732_s26 }
 0x136   :  { %373 = vrot.lane.b32.xlu1 %v901_v54, %s733_s16  ;;  %371 = vrot.lane.b32.xlu0 %v884_v44, %s733_s16 }
 0x13a   :  { %389 = vrot.lane.b32.xlu1 %v908_v55, %s733_s16  ;;  %387 = vrot.lane.b32.xlu0 %v886_v47, %s733_s16 }
 0x13e   :  { %437 = vrot.lane.b32.xlu1 %v901_v54, %s734_s10  ;;  %435 = vrot.lane.b32.xlu0 %v884_v44, %s734_s10 }
 0x142   :  { %453 = vrot.lane.b32.xlu1 %v908_v55, %s734_s10  ;;  %451 = vrot.lane.b32.xlu0 %v886_v47, %s734_s10 }
 0x146   :  { %501 = vrot.lane.b32.xlu1 %v901_v54, %s735_s11  ;;  %499 = vrot.lane.b32.xlu0 %v884_v44, %s735_s11 }
 0x14a   :  { %517 = vrot.lane.b32.xlu1 %v908_v55, %s735_s11  ;;  %515 = vrot.lane.b32.xlu0 %v886_v47, %s735_s11 }
 0x14e   :  { %565 = vrot.lane.b32.xlu1 %v901_v54, %s736_s3  ;;  %563 = vrot.lane.b32.xlu0 %v884_v44, %s736_s3 }
 0x150   :  { %v316_v58 = vpop.permute.xlu0 %315  ;;  %v300_v59 = vpop.permute.xlu1 %299 }
 0x151   :  { %353 = vst.msk [vmem:[%s1416_s4 + $0x28] sm:$0xf] %vm278_vm1, %v316_v58  ;;  %345 = vst.msk [vmem:[%s1416_s4 + $0x8] sm:$0xf] %vm278_vm1, %v300_v59 }
 0x152   :  { %305 = vrot.lane.b32.xlu1 %v915_v56, %s732_s26  ;;  %303 = vrot.lane.b32.xlu0 %v888_v50, %s732_s26 }
 0x154   :  { %v364_v60 = vpop.permute.xlu0 %363  ;;  %v302_v61 = vpop.permute.xlu1 %301 }
 0x155   :  { %409 = vst.msk [vmem:[%s1417_s5 + $0x8] sm:$0xf] %vm278_vm1, %v364_v60  ;;  %346 = vst.msk [vmem:[%s1416_s4 + $0xc] sm:$0xf] %vm278_vm1, %v302_v61 }
 0x156   :  { %321 = vrot.lane.b32.xlu1 %v922_v57, %s732_s26  ;;  %319 = vrot.lane.b32.xlu0 %v890_v52, %s732_s26 }
 0x158   :  { %v380_v62 = vpop.permute.xlu0 %379  ;;  %v318_v63 = vpop.permute.xlu1 %317 }
 0x159   :  { %417 = vst.msk [vmem:[%s1417_s5 + $0x28] sm:$0xf] %vm278_vm1, %v380_v62  ;;  %354 = vst.msk [vmem:[%s1416_s4 + $0x2c] sm:$0xf] %vm278_vm1, %v318_v63 }
 0x15a   :  { %369 = vrot.lane.b32.xlu1 %v915_v56, %s733_s16  ;;  %367 = vrot.lane.b32.xlu0 %v888_v50, %s733_s16 }
 0x15c   :  { %v428_v0 = vpop.permute.xlu0 %427  ;;  %v366_v1 = vpop.permute.xlu1 %365 }
 0x15d   :  { %473 = vst.msk [vmem:[%s1418_s6 + $0x8] sm:$0xf] %vm278_vm1, %v428_v0  ;;  %410 = vst.msk [vmem:[%s1417_s5 + $0xc] sm:$0xf] %vm278_vm1, %v366_v1 }
 0x15e   :  { %385 = vrot.lane.b32.xlu1 %v922_v57, %s733_s16  ;;  %383 = vrot.lane.b32.xlu0 %v890_v52, %s733_s16 }
 0x160   :  { %v444_v2 = vpop.permute.xlu0 %443  ;;  %v382_v3 = vpop.permute.xlu1 %381 }
 0x161   :  { %481 = vst.msk [vmem:[%s1418_s6 + $0x28] sm:$0xf] %vm278_vm1, %v444_v2  ;;  %418 = vst.msk [vmem:[%s1417_s5 + $0x2c] sm:$0xf] %vm278_vm1, %v382_v3 }
 0x162   :  { %433 = vrot.lane.b32.xlu1 %v915_v56, %s734_s10  ;;  %431 = vrot.lane.b32.xlu0 %v888_v50, %s734_s10 }
 0x164   :  { %v492_v4 = vpop.permute.xlu0 %491  ;;  %v430_v5 = vpop.permute.xlu1 %429 }
 0x165   :  { %537 = vst.msk [vmem:[%s1419_s7 + $0x8] sm:$0xf] %vm278_vm1, %v492_v4  ;;  %474 = vst.msk [vmem:[%s1418_s6 + $0xc] sm:$0xf] %vm278_vm1, %v430_v5 }
 0x166   :  { %449 = vrot.lane.b32.xlu1 %v922_v57, %s734_s10  ;;  %447 = vrot.lane.b32.xlu0 %v890_v52, %s734_s10 }
 0x168   :  { %v508_v6 = vpop.permute.xlu0 %507  ;;  %v446_v7 = vpop.permute.xlu1 %445 }
 0x169   :  { %545 = vst.msk [vmem:[%s1419_s7 + $0x28] sm:$0xf] %vm278_vm1, %v508_v6  ;;  %482 = vst.msk [vmem:[%s1418_s6 + $0x2c] sm:$0xf] %vm278_vm1, %v446_v7 }
 0x16a   :  { %497 = vrot.lane.b32.xlu1 %v915_v56, %s735_s11  ;;  %495 = vrot.lane.b32.xlu0 %v888_v50, %s735_s11 }
 0x16c   :  { %v556_v8 = vpop.permute.xlu0 %555  ;;  %v494_v9 = vpop.permute.xlu1 %493 }
 0x16d   :  { %601 = vst.msk [vmem:[%s1420_s8 + $0x8] sm:$0xf] %vm278_vm1, %v556_v8  ;;  %538 = vst.msk [vmem:[%s1419_s7 + $0xc] sm:$0xf] %vm278_vm1, %v494_v9 }
 0x16e   :  { %513 = vrot.lane.b32.xlu1 %v922_v57, %s735_s11  ;;  %511 = vrot.lane.b32.xlu0 %v890_v52, %s735_s11 }
 0x170   :  { %v572_v10 = vpop.permute.xlu0 %571  ;;  %v510_v11 = vpop.permute.xlu1 %509 }
 0x171   :  { %609 = vst.msk [vmem:[%s1420_s8 + $0x28] sm:$0xf] %vm278_vm1, %v572_v10  ;;  %546 = vst.msk [vmem:[%s1419_s7 + $0x2c] sm:$0xf] %vm278_vm1, %v510_v11 }
 0x172   :  { %561 = vrot.lane.b32.xlu1 %v915_v56, %s736_s3  ;;  %559 = vrot.lane.b32.xlu0 %v888_v50, %s736_s3 }
 0x174   :  { %v558_v12 = vpop.permute.xlu1 %557  ;;  %v296_v13 = vpop.permute.xlu0 %295 }
 0x175   :  { %602 = vst.msk [vmem:[%s1420_s8 + $0xc] sm:$0xf] %vm278_vm1, %v558_v12  ;;  %343 = vst.msk [vmem:[%s1416_s4] sm:$0xf] %vm278_vm1, %v296_v13 }
 0x176   :  { %577 = vrot.lane.b32.xlu1 %v922_v57, %s736_s3  ;;  %575 = vrot.lane.b32.xlu0 %v890_v52, %s736_s3 }
 0x178   :  { %v574_v14 = vpop.permute.xlu1 %573  ;;  %v312_v15 = vpop.permute.xlu0 %311 }
 0x179   :  { %610 = vst.msk [vmem:[%s1420_s8 + $0x2c] sm:$0xf] %vm278_vm1, %v574_v14  ;;  %351 = vst.msk [vmem:[%s1416_s4 + $0x20] sm:$0xf] %vm278_vm1, %v312_v15 }
 0x17a   :  { %581 = vrot.lane.b32.xlu1 %v908_v55, %s736_s3  ;;  %579 = vrot.lane.b32.xlu0 %v886_v47, %s736_s3 }
 0x17c   :  { %v314_v16 = vpop.permute.xlu1 %313  ;;  %v360_v17 = vpop.permute.xlu0 %359 }
 0x17d   :  { %352 = vst.msk [vmem:[%s1416_s4 + $0x24] sm:$0xf] %vm278_vm1, %v314_v16  ;;  %407 = vst.msk [vmem:[%s1417_s5] sm:$0xf] %vm278_vm1, %v360_v17 }
 0x180   :  { %v362_v18 = vpop.permute.xlu1 %361  ;;  %v376_v19 = vpop.permute.xlu0 %375 }
 0x181   :  { %408 = vst.msk [vmem:[%s1417_s5 + $0x4] sm:$0xf] %vm278_vm1, %v362_v18  ;;  %415 = vst.msk [vmem:[%s1417_s5 + $0x20] sm:$0xf] %vm278_vm1, %v376_v19 }
 0x184   :  { %v378_v20 = vpop.permute.xlu1 %377  ;;  %v424_v21 = vpop.permute.xlu0 %423 }
 0x185   :  { %416 = vst.msk [vmem:[%s1417_s5 + $0x24] sm:$0xf] %vm278_vm1, %v378_v20  ;;  %471 = vst.msk [vmem:[%s1418_s6] sm:$0xf] %vm278_vm1, %v424_v21 }
 0x188   :  { %v426_v22 = vpop.permute.xlu1 %425  ;;  %v440_v23 = vpop.permute.xlu0 %439 }
 0x189   :  { %472 = vst.msk [vmem:[%s1418_s6 + $0x4] sm:$0xf] %vm278_vm1, %v426_v22  ;;  %479 = vst.msk [vmem:[%s1418_s6 + $0x20] sm:$0xf] %vm278_vm1, %v440_v23 }
 0x18c   :  { %v442_v24 = vpop.permute.xlu1 %441  ;;  %v488_v25 = vpop.permute.xlu0 %487 }
 0x18d   :  { %480 = vst.msk [vmem:[%s1418_s6 + $0x24] sm:$0xf] %vm278_vm1, %v442_v24  ;;  %535 = vst.msk [vmem:[%s1419_s7] sm:$0xf] %vm278_vm1, %v488_v25 }
 0x190   :  { %v490_v26 = vpop.permute.xlu1 %489  ;;  %v504_v27 = vpop.permute.xlu0 %503 }
 0x191   :  { %536 = vst.msk [vmem:[%s1419_s7 + $0x4] sm:$0xf] %vm278_vm1, %v490_v26  ;;  %543 = vst.msk [vmem:[%s1419_s7 + $0x20] sm:$0xf] %vm278_vm1, %v504_v27 }
 0x194   :  { %v506_v28 = vpop.permute.xlu1 %505  ;;  %v552_v29 = vpop.permute.xlu0 %551 }
 0x195   :  { %544 = vst.msk [vmem:[%s1419_s7 + $0x24] sm:$0xf] %vm278_vm1, %v506_v28  ;;  %599 = vst.msk [vmem:[%s1420_s8] sm:$0xf] %vm278_vm1, %v552_v29 }
 0x198   :  { %v554_v30 = vpop.permute.xlu1 %553  ;;  %v568_v31 = vpop.permute.xlu0 %567 }
 0x199   :  { %600 = vst.msk [vmem:[%s1420_s8 + $0x4] sm:$0xf] %vm278_vm1, %v554_v30  ;;  %607 = vst.msk [vmem:[%s1420_s8 + $0x20] sm:$0xf] %vm278_vm1, %v568_v31 }
 0x19c   :  { %v570_v32 = vpop.permute.xlu1 %569  ;;  %v298_v33 = vpop.permute.xlu0 %297 }
 0x19d   :  { %608 = vst.msk [vmem:[%s1420_s8 + $0x24] sm:$0xf] %vm278_vm1, %v570_v32  ;;  %344 = vst.msk [vmem:[%s1416_s4 + $0x4] sm:$0xf] %vm278_vm1, %v298_v33 }
 0x1a0   :  { %v310_v34 = vpop.permute.xlu1 %309  ;;  %v308_v35 = vpop.permute.xlu0 %307 }
 0x1a1   :  { %350 = vst.msk [vmem:[%s1416_s4 + $0x1c] sm:$0xf] %vm278_vm1, %v310_v34  ;;  %349 = vst.msk [vmem:[%s1416_s4 + $0x18] sm:$0xf] %vm278_vm1, %v308_v35 }
 0x1a4   :  { %v326_v36 = vpop.permute.xlu1 %325  ;;  %v324_v37 = vpop.permute.xlu0 %323 }
 0x1a5   :  { %358 = vst.msk [vmem:[%s1416_s4 + $0x3c] sm:$0xf] %vm278_vm1, %v326_v36  ;;  %357 = vst.msk [vmem:[%s1416_s4 + $0x38] sm:$0xf] %vm278_vm1, %v324_v37 }
 0x1a8   :  { %v374_v38 = vpop.permute.xlu1 %373  ;;  %v372_v39 = vpop.permute.xlu0 %371 }
 0x1a9   :  { %414 = vst.msk [vmem:[%s1417_s5 + $0x1c] sm:$0xf] %vm278_vm1, %v374_v38  ;;  %413 = vst.msk [vmem:[%s1417_s5 + $0x18] sm:$0xf] %vm278_vm1, %v372_v39 }
 0x1ac   :  { %v390_v40 = vpop.permute.xlu1 %389  ;;  %v388_v41 = vpop.permute.xlu0 %387 }
 0x1ad   :  { %422 = vst.msk [vmem:[%s1417_s5 + $0x3c] sm:$0xf] %vm278_vm1, %v390_v40  ;;  %421 = vst.msk [vmem:[%s1417_s5 + $0x38] sm:$0xf] %vm278_vm1, %v388_v41 }
 0x1b0   :  { %v438_v42 = vpop.permute.xlu1 %437  ;;  %v436_v43 = vpop.permute.xlu0 %435 }
 0x1b1   :  { %478 = vst.msk [vmem:[%s1418_s6 + $0x1c] sm:$0xf] %vm278_vm1, %v438_v42  ;;  %477 = vst.msk [vmem:[%s1418_s6 + $0x18] sm:$0xf] %vm278_vm1, %v436_v43 }
 0x1b4   :  { %v454_v44 = vpop.permute.xlu1 %453  ;;  %v452_v45 = vpop.permute.xlu0 %451 }
 0x1b5   :  { %486 = vst.msk [vmem:[%s1418_s6 + $0x3c] sm:$0xf] %vm278_vm1, %v454_v44  ;;  %485 = vst.msk [vmem:[%s1418_s6 + $0x38] sm:$0xf] %vm278_vm1, %v452_v45 }
 0x1b8   :  { %v502_v46 = vpop.permute.xlu1 %501  ;;  %v500_v47 = vpop.permute.xlu0 %499 }
 0x1b9   :  { %542 = vst.msk [vmem:[%s1419_s7 + $0x1c] sm:$0xf] %vm278_vm1, %v502_v46  ;;  %541 = vst.msk [vmem:[%s1419_s7 + $0x18] sm:$0xf] %vm278_vm1, %v500_v47 }
 0x1bc   :  { %v518_v48 = vpop.permute.xlu1 %517  ;;  %v516_v49 = vpop.permute.xlu0 %515 }
 0x1bd   :  { %550 = vst.msk [vmem:[%s1419_s7 + $0x3c] sm:$0xf] %vm278_vm1, %v518_v48  ;;  %549 = vst.msk [vmem:[%s1419_s7 + $0x38] sm:$0xf] %vm278_vm1, %v516_v49 }
 0x1c0   :  { %v566_v50 = vpop.permute.xlu1 %565  ;;  %v564_v51 = vpop.permute.xlu0 %563 }
 0x1c1   :  { %606 = vst.msk [vmem:[%s1420_s8 + $0x1c] sm:$0xf] %vm278_vm1, %v566_v50  ;;  %605 = vst.msk [vmem:[%s1420_s8 + $0x18] sm:$0xf] %vm278_vm1, %v564_v51 }
 0x1c4   :  { %v306_v52 = vpop.permute.xlu1 %305  ;;  %v304_v53 = vpop.permute.xlu0 %303 }
 0x1c5   :  { %348 = vst.msk [vmem:[%s1416_s4 + $0x14] sm:$0xf] %vm278_vm1, %v306_v52  ;;  %347 = vst.msk [vmem:[%s1416_s4 + $0x10] sm:$0xf] %vm278_vm1, %v304_v53 }
 0x1c8   :  { %v322_v54 = vpop.permute.xlu1 %321  ;;  %v320_v55 = vpop.permute.xlu0 %319 }
 0x1c9   :  { %356 = vst.msk [vmem:[%s1416_s4 + $0x34] sm:$0xf] %vm278_vm1, %v322_v54  ;;  %355 = vst.msk [vmem:[%s1416_s4 + $0x30] sm:$0xf] %vm278_vm1, %v320_v55 }
 0x1cc   :  { %v370_v56 = vpop.permute.xlu1 %369  ;;  %v368_v57 = vpop.permute.xlu0 %367 }
 0x1cd   :  { %412 = vst.msk [vmem:[%s1417_s5 + $0x14] sm:$0xf] %vm278_vm1, %v370_v56  ;;  %411 = vst.msk [vmem:[%s1417_s5 + $0x10] sm:$0xf] %vm278_vm1, %v368_v57 }
 0x1d0   :  { %v386_v58 = vpop.permute.xlu1 %385  ;;  %v384_v59 = vpop.permute.xlu0 %383 }
 0x1d1   :  { %420 = vst.msk [vmem:[%s1417_s5 + $0x34] sm:$0xf] %vm278_vm1, %v386_v58  ;;  %419 = vst.msk [vmem:[%s1417_s5 + $0x30] sm:$0xf] %vm278_vm1, %v384_v59 }
 0x1d4   :  { %v434_v60 = vpop.permute.xlu1 %433  ;;  %v432_v61 = vpop.permute.xlu0 %431 }
 0x1d5   :  { %476 = vst.msk [vmem:[%s1418_s6 + $0x14] sm:$0xf] %vm278_vm1, %v434_v60  ;;  %475 = vst.msk [vmem:[%s1418_s6 + $0x10] sm:$0xf] %vm278_vm1, %v432_v61 }
 0x1d8   :  { %v450_v62 = vpop.permute.xlu1 %449  ;;  %v448_v63 = vpop.permute.xlu0 %447 }
 0x1d9   :  { %484 = vst.msk [vmem:[%s1418_s6 + $0x34] sm:$0xf] %vm278_vm1, %v450_v62  ;;  %483 = vst.msk [vmem:[%s1418_s6 + $0x30] sm:$0xf] %vm278_vm1, %v448_v63 }
 0x1dc   :  { %v498_v0 = vpop.permute.xlu1 %497  ;;  %v496_v1 = vpop.permute.xlu0 %495 }
 0x1dd   :  { %540 = vst.msk [vmem:[%s1419_s7 + $0x14] sm:$0xf] %vm278_vm1, %v498_v0  ;;  %539 = vst.msk [vmem:[%s1419_s7 + $0x10] sm:$0xf] %vm278_vm1, %v496_v1 }
 0x1e0   :  { %v514_v2 = vpop.permute.xlu1 %513  ;;  %v512_v3 = vpop.permute.xlu0 %511 }
 0x1e1   :  { %548 = vst.msk [vmem:[%s1419_s7 + $0x34] sm:$0xf] %vm278_vm1, %v514_v2  ;;  %547 = vst.msk [vmem:[%s1419_s7 + $0x30] sm:$0xf] %vm278_vm1, %v512_v3 }
 0x1e4   :  { %v562_v4 = vpop.permute.xlu1 %561  ;;  %v560_v5 = vpop.permute.xlu0 %559 }
 0x1e5   :  { %604 = vst.msk [vmem:[%s1420_s8 + $0x14] sm:$0xf] %vm278_vm1, %v562_v4  ;;  %603 = vst.msk [vmem:[%s1420_s8 + $0x10] sm:$0xf] %vm278_vm1, %v560_v5 }
 0x1e8   :  { %v578_v6 = vpop.permute.xlu1 %577  ;;  %v576_v7 = vpop.permute.xlu0 %575 }
 0x1e9   :  { %612 = vst.msk [vmem:[%s1420_s8 + $0x34] sm:$0xf] %vm278_vm1, %v578_v6  ;;  %611 = vst.msk [vmem:[%s1420_s8 + $0x30] sm:$0xf] %vm278_vm1, %v576_v7 }
 0x1ec   :  { %v582_v8 = vpop.permute.xlu1 %581  ;;  %v580_v9 = vpop.permute.xlu0 %579 }
 0x1ed   :  { %614 = vst.msk [vmem:[%s1420_s8 + $0x3c] sm:$0xf] %vm278_vm1, %v582_v8  ;;  %613 = vst.msk [vmem:[%s1420_s8 + $0x38] sm:$0xf] %vm278_vm1, %v580_v9 }

// kernel: fwd.4
= control target key start
LH: loop header
LB: loop body
LE: loop exit
PB: predicated region body
PF: predicated region fallthrough
CT: control target
= control target key end

     0   :  { %s994_s12 = smov 0   ;;  %s996_s13 = smov 0   ;;  %s1108_s0 = inlined_call_operand.vmem [shape: bf16[2,2,8,8], index: 0, kind: input, shape index: {}]   ;;  %s1109_s1 = inlined_call_operand.vmem [shape: bf16[2,2,64,8], index: 1, kind: input, shape index: {}]   ;;  %s1110_s2 = inlined_call_operand.vmem [shape: bf16[2,2,64,8], index: 2, kind: input, shape index: {}]   ;;  %s1111_s3 = inlined_call_operand.vmem [shape: f32[2,8,16], index: 3, kind: output, shape index: {}]  }
   0x1   :  { %s998_s14 = smov 0  }
   0x2 LB: > { %s25_s15 = sadd.s32 1, %s963_s13  ;;  %p785_p0 = scmp.ge.s32.totalorder %s967_s14, 1  ;;  %s967_s14 = sphi %s998_s14, %s13_s14   ;;  %s963_s13 = sphi %s996_s13, %s1113_s13   ;;  %s959_s12 = sphi %s994_s12, %s1112_s12  }
   0x3   : > { %p27_p1 = scmp.ge.s32.totalorder %s25_s15, 2  ;;  %p183_p2 = scmp.lt.s32.totalorder %s967_s14, 3 }
   0x5   : > { %s1115_s15 = smov (%p27_p1, %s25_s15), 0  ;;  %p184_p3 = pnand %p785_p0, %p183_p2 }
   0x6   : > { %p224_p4 = scmp.lt.s32.totalorder (!%p184_p3), %s959_s12, 1  ;;  %vm263_vm0 = vcmask (!%p184_p3), 64512   ;;  %v969_v0 = vmov (!%p184_p3), 0.0   ;;  %vm970_vm1 = vmmov (!%p184_p3), 0   ;;  %vm258_vm2 = vcmask (!%p184_p3), 7168   ;;  %s973_s27 = smov (!%p184_p3), 8  }
   0x7   : > { %187 = sbr.rel (%p184_p3) target bundleno = 961 (0x3c1), region = 32  ;;  %850 = vmatprep.subr.bf16.mxu1 (!%p184_p3), %v969_v0  ;;  %264 = vst.msk [vmem:[#allocation2] sm:$0xff] (!%p184_p3), %vm263_vm0, %v969_v0  ;;  %265 = vst.msk [vmem:[#allocation2 + $0x8] sm:$0xff] (!%p184_p3), %vm263_vm0, %v969_v0  ;;  %838 = vmatprep.subr.bf16.mxu0 (!%p184_p3), %v969_v0  ;;  %v971_v19 = vmov (!%p184_p3), -1e+30   ;;  %vm453_vm3 = vcmask (!%p184_p3), 523264  }
   0x8   : > { %858 = vmatprep.mubr.msk.bf16.mxu1 (!%p184_p3), %vm970_vm1, %v969_v0  ;;  %846 = vmatprep.mubr.msk.bf16.mxu0 (!%p184_p3), %vm970_vm1, %v969_v0  ;;  %260 = vst.msk [vmem:[#allocation3 + $0x8] sm:$0xff] (!%p184_p3), %vm258_vm2, %v971_v19  ;;  %259 = vst.msk [vmem:[#allocation3] sm:$0xff] (!%p184_p3), %vm258_vm2, %v971_v19  ;;  %v972_v30 = vmov (!%p184_p3), 0   ;;  %vm682_vm4 = vcmask (!%p184_p3), 130048  }
   0x9   : > { %261 = vst.msk [vmem:[#allocation4] sm:$0xff] (!%p184_p3), %vm258_vm2, %v969_v0  ;;  %262 = vst.msk [vmem:[#allocation4 + $0x8] sm:$0xff] (!%p184_p3), %vm258_vm2, %v969_v0  ;;  %915 = vset.pattern.permute.xlu1 (!%p184_p3), %v972_v30  ;;  %916 = vset.pattern.permute.xlu0 (!%p184_p3), %v972_v30 }
   0xe   : > { %s1117_s12 = smov (!%p224_p4, %s959_s12), 1 }
   0xf   : > { %s816_s16 = sshll.u32 %s1117_s12, 6  ;;  %s815_s23 = sshll.u32 %s1117_s12, 3  ;;  %v452_v31 = vld [vmem:[#allocation3 + $0x8] sm:$0xff]  ;;  %v451_v34 = vld [vmem:[#allocation3] sm:$0xff] }
  0x10   : > { %s237_s19 = scalar_lea.vmem %s1109_s1, %s816_s16  ;;  %s1035_s22 = scalar_lea.vmem %s1110_s2, %s816_s16  ;;  %v488_v63 = vld [vmem:[#allocation4 + $0x8] sm:$0xff] }
  0x11   : > { %v917_v1 = vld [vmem:[%s237_s19 + $0x20] sm:$0xff]   ;;  %v919_v5 = vld [vmem:[%s237_s19 + $0x28] sm:$0xff]   ;;  %v921_v9 = vld [vmem:[%s237_s19 + $0x30] sm:$0xff]   ;;  %s228_s26 = scalar_lea.vmem %s1108_s0, %s815_s23  ;;  %s252_s30 = scalar_lea.vmem %s1111_s3, %s815_s23 }
  0x12   : > { %v918_v2 = vld [vmem:[%s237_s19] sm:$0xff]   ;;  %v400_v3 = vsel %vm263_vm0, %v917_v1, 0  ;;  %v920_v6 = vld [vmem:[%s237_s19 + $0x8] sm:$0xff]   ;;  %v403_v7 = vsel %vm263_vm0, %v919_v5, 0  ;;  %v922_v10 = vld [vmem:[%s237_s19 + $0x10] sm:$0xff]   ;;  %v406_v11 = vsel %vm263_vm0, %v921_v9, 0 }
  0x13   : > { %851 = vmatpush3.bf16.xpose.msra.mxu1 %v400_v3  ;;  %v325_v4 = vsel %vm263_vm0, %v918_v2, 0  ;;  %v328_v8 = vsel %vm263_vm0, %v920_v6, 0  ;;  %v331_v12 = vsel %vm263_vm0, %v922_v10, 0  ;;  %v923_v13 = vld [vmem:[%s237_s19 + $0x38] sm:$0xff]   ;;  %v267_v17 = vld [vmem:[%s228_s26 + $0x4] sm:$0xf] }
  0x14   : > { %839 = vmatpush3.bf16.xpose.msra.mxu0 %v325_v4  ;;  %852 = vmatprep.subr.bf16.mxu1 %v969_v0  ;;  %v924_v14 = vld [vmem:[%s237_s19 + $0x18] sm:$0xff]   ;;  %v409_v15 = vsel %vm263_vm0, %v923_v13, 0  ;;  %v266_v18 = vld [vmem:[%s228_s26] sm:$0xf]  ;;  %v927_v41 = vld [vmem:[%s1035_s22 + $0x28] sm:$0xff]  }
  0x15   : > { %840 = vmatprep.subr.bf16.mxu0 %v969_v0  ;;  %v334_v16 = vsel %vm263_vm0, %v924_v14, 0  ;;  %v925_v36 = vld [vmem:[%s1035_s22 + $0x20] sm:$0xff]   ;;  %v928_v42 = vld [vmem:[%s1035_s22 + $0x8] sm:$0xff]   ;;  %v929_v43 = vld [vmem:[%s1035_s22 + $0x30] sm:$0xff]  }
  0x16   : > { %v926_v40 = vld [vmem:[%s1035_s22] sm:$0xff]   ;;  %v930_v44 = vld [vmem:[%s1035_s22 + $0x10] sm:$0xff]   ;;  %v931_v45 = vld [vmem:[%s1035_s22 + $0x38] sm:$0xff]  }
  0x17   : > { %v932_v46 = vld [vmem:[%s1035_s22 + $0x18] sm:$0xff]   ;;  %v487_v2 = vld [vmem:[#allocation4] sm:$0xff] }
  0x18   : > { %v501_v14 = vld [vmem:[#allocation2] sm:$0xff] }
  0x1b   : > { %853 = vmatpush3.bf16.xpose.msra.mxu1 %v403_v7 }
  0x1c   : > { %841 = vmatpush3.bf16.xpose.msra.mxu0 %v328_v8  ;;  %854 = vmatprep.subr.bf16.mxu1 %v969_v0 }
  0x1d   : > { %842 = vmatprep.subr.bf16.mxu0 %v969_v0 }
  0x23   : > { %855 = vmatpush3.bf16.xpose.msra.mxu1 %v406_v11 }
  0x24   : > { %843 = vmatpush3.bf16.xpose.msra.mxu0 %v331_v12  ;;  %856 = vmatprep.subr.bf16.mxu1 %v969_v0  ;;  %v502_v12 = vld [vmem:[#allocation2 + $0x8] sm:$0xff] }
  0x25   : > { %844 = vmatprep.subr.bf16.mxu0 %v969_v0 }
  0x2b   : > { %857 = vmatpush3.bf16.xpose.msra.mxu1 %v409_v15 }
  0x2c   : > { %845 = vmatpush3.bf16.xpose.msra.mxu0 %v334_v16  ;;  %874 = vmatprep.subr.bf16.mxu1 %v969_v0 }
  0x2d   : > { %862 = vmatprep.subr.bf16.mxu0 %v969_v0 }
  0x32   : > { %859 = vmatmul.mubr.msk.bf16.vlgmr.msra.gmra.mrb[0].mxu1 %vm263_vm0, %v267_v17 }
  0x33   : > { %847 = vmatmul.mubr.msk.bf16.vlgmr.msra.gmra.mrb[0].mxu0 %vm263_vm0, %v266_v18  ;;  %882 = vmatprep.mubr.msk.bf16.mxu1 %vm970_vm1, %v969_v0 }
  0x34   : > { %870 = vmatprep.mubr.msk.bf16.mxu0 %vm970_vm1, %v969_v0  ;;  %875 = vmatpush3.bf16.msra.mxu1 %v925_v36 }
  0x35   : > { %876 = vmatprep.subr.bf16.mxu1 %v969_v0  ;;  %863 = vmatpush3.bf16.msra.mxu0 %v926_v40 }
  0x36   : > { %864 = vmatprep.subr.bf16.mxu0 %v969_v0 }
  0x38   : > { %877 = vmatpush3.bf16.msra.mxu1 %v927_v41 }
  0x39   : > { %878 = vmatprep.subr.bf16.mxu1 %v969_v0  ;;  %865 = vmatpush3.bf16.msra.mxu0 %v928_v42 }
  0x3a   : > { %866 = vmatprep.subr.bf16.mxu0 %v969_v0 }
  0x3c   : > { %879 = vmatpush3.bf16.msra.mxu1 %v929_v43 }
  0x3d   : > { %880 = vmatprep.subr.bf16.mxu1 %v969_v0  ;;  %867 = vmatpush3.bf16.msra.mxu0 %v930_v44 }
  0x3e   : > { %868 = vmatprep.subr.bf16.mxu0 %v969_v0 }
  0x40   : > { %881 = vmatpush3.bf16.msra.mxu1 %v931_v45 }
  0x41   : > { %869 = vmatpush3.bf16.msra.mxu0 %v932_v46 }
 0x105   : > { %v445_v20 = vpop.f32.mrb[0].mxu1 }
 0x106   : > { %v860_v21 = vpop.f32.mrb[1].mxu1  ;;  %v457_v22 = vsel %vm453_vm3, %v445_v20, -inf  ;;  %v370_v23 = vpop.f32.mrb[0].mxu0 }
 0x107   : > { %458 = vmax.xlane.f32.xlu0 %v457_v22  ;;  %v448_v24 = vpop.f32.mrb[2].mxu1  ;;  %v848_v25 = vpop.f32.mrb[1].mxu0  ;;  %v454_v27 = vsel %vm453_vm3, %v370_v23, -inf }
 0x108   : > { %v861_v26 = vpop.f32.mrb[3].mxu1  ;;  %v373_v28 = vpop.f32.mrb[2].mxu0 }
 0x109   : > { %v849_v29 = vpop.f32.mrb[3].mxu0 }
 0x10b   : > { %455 = vmax.xlane.f32.xlu0 %v454_v27 }
 0x194   : > { %v459_v32 = vpop.xlane.xlu0 %458 }
 0x195   : > { %v461_v33 = vmax.f32 %v452_v31, %v459_v32 }
 0x197   : > { %v463_v35 = vsub.f32 %v452_v31, %v461_v33  ;;  %486 = vst.msk [vmem:[#allocation3 + $0x8] sm:$0xff] %vm258_vm2, %v461_v33  ;;  %475 = vperm.xlu1 %915, %v461_v33  }
 0x198   : > { %v456_v37 = vpop.xlane.xlu0 %455 }
 0x199   : > { %v460_v38 = vmax.f32 %v451_v34, %v456_v37  ;;  %v466_v59 = vmul.f32 1.442695, %v463_v35 }
 0x19b   : > { %v462_v39 = vsub.f32 %v451_v34, %v460_v38  ;;  %485 = vst.msk [vmem:[#allocation3] sm:$0xff] %vm258_vm2, %v460_v38  ;;  %470 = vperm.xlu1 %915, %v460_v38  }
 0x19d   : > { %v464_v60 = vmul.f32 1.442695, %v462_v39 }
 0x216   : > { %v476_v47 = vpop.permute.xlu1 %475 }
 0x217   : > { %v479_v48 = vsub.f32 %v445_v20, %v476_v47 }
 0x219   : > { %v482_v49 = vmul.f32 1.442695, %v479_v48 }
 0x21a   : > { %v471_v50 = vpop.permute.xlu1 %470 }
 0x21b   : > { %933 = vpow2.f32 %v482_v49  ;;  %v478_v51 = vsub.f32 %v370_v23, %v471_v50 }
 0x21d   : > { %v480_v52 = vmul.f32 1.442695, %v478_v51 }
 0x21f   : > { %935 = vpow2.f32 %v480_v52 }
 0x220   : > { %937 = vpow2.f32 %v466_v59 }
 0x221   : > { %939 = vpow2.f32 %v464_v60 }
 0x225   : > { %v934_v53 = vpop.eup %933 }
 0x226   : > { %v494_v54 = vsel %vm453_vm3, %v934_v53, 0.0  ;;  %v516_v55 = vpack.c.bf16 %v934_v53, %v934_v53 }
 0x227   : > { %495 = vadd.xlane.f32.xlu0 %v494_v54 }
 0x228   : > { %883 = vmatmul.mubr.msk.bf16.vlgmr.msra.gmra.mrb[4].mxu1 %vm453_vm3, %v516_v55 }
 0x229   : > { %v936_v56 = vpop.eup %935 }
 0x22a   : > { %v491_v57 = vsel %vm453_vm3, %v936_v56, 0.0  ;;  %v515_v58 = vpack.c.bf16 %v936_v56, %v936_v56  ;;  %v938_v61 = vpop.eup %937 }
 0x22b   : > { %492 = vadd.xlane.f32.xlu1 %v491_v57  ;;  %v940_v62 = vpop.eup %939  ;;  %v490_v0 = vmul.f32 %v938_v61, %v488_v63 }
 0x22c   : > { %871 = vmatmul.mubr.msk.bf16.vlgmr.msra.gmra.mrb[4].mxu0 %vm453_vm3, %v515_v58  ;;  %v489_v4 = vmul.f32 %v940_v62, %v487_v2 }
 0x23d   : > { %510 = vperm.xlu0 %916, %v938_v61  }
 0x241   : > { %505 = vperm.xlu0 %916, %v940_v62  }
 0x2b4   : > { %v496_v1 = vpop.xlane.xlu0 %495 }
 0x2b5   : > { %v498_v3 = vadd.f32 %v496_v1, %v490_v0 }
 0x2b7   : > { %500 = vst.msk [vmem:[#allocation4 + $0x8] sm:$0xff] %vm258_vm2, %v498_v3 }
 0x2b8   : > { %v493_v5 = vpop.xlane.xlu1 %492 }
 0x2b9   : > { %v497_v6 = vadd.f32 %v493_v5, %v489_v4 }
 0x2bb   : > { %499 = vst.msk [vmem:[#allocation4] sm:$0xff] %vm258_vm2, %v497_v6 }
 0x2bc   : > { %v511_v11 = vpop.permute.xlu0 %510 }
 0x2bd   : > { %v514_v13 = vmul.f32 %v511_v11, %v502_v12 }
 0x2be   : > { %v659_v7 = vld [vmem:[#allocation4 + $0x8] sm:$0xff] }
 0x2bf   : > { %941 = vrcp.f32 %v659_v7 }
 0x2c0   : > { %v506_v15 = vpop.permute.xlu0 %505 }
 0x2c1   : > { %v513_v20 = vmul.f32 %v506_v15, %v501_v14 }
 0x2c2   : > { %v658_v8 = vld [vmem:[#allocation4] sm:$0xff] }
 0x2c3   : > { %943 = vrcp.f32 %v658_v8 }
 0x2c9   : > { %v942_v9 = vpop.eup %941 }
 0x2ca   : > { %673 = vperm.xlu1 %915, %v942_v9  }
 0x2cd   : > { %v944_v10 = vpop.eup %943 }
 0x2ce   : > { %665 = vperm.xlu0 %916, %v944_v10  }
 0x2fb   : > { %v645_v16 = vpop.f32.mrb[4].mxu1 }
 0x2fc   : > { %v652_v17 = vadd.f32 %v645_v16, %v514_v13  ;;  %v884_v18 = vpop.f32.mrb[5].mxu1 }
 0x2fd   : > { %v648_v19 = vpop.f32.mrb[6].mxu1 }
 0x2fe   : > { %654 = vst.msk [vmem:[#allocation2 + $0x8] sm:$0xff] %vm263_vm0, %v652_v17  ;;  %v885_v21 = vpop.f32.mrb[7].mxu1 }
 0x2ff   : > { %v578_v22 = vpop.f32.mrb[4].mxu0 }
 0x300   : > { %v651_v23 = vadd.f32 %v578_v22, %v513_v20  ;;  %v872_v24 = vpop.f32.mrb[5].mxu0 }
 0x301   : > { %v581_v25 = vpop.f32.mrb[6].mxu0 }
 0x302   : > { %653 = vst.msk [vmem:[#allocation2] sm:$0xff] %vm263_vm0, %v651_v23  ;;  %v873_v26 = vpop.f32.mrb[7].mxu0 }
 0x305   : > { %v670_v28 = vld [vmem:[#allocation2 + $0x8] sm:$0xff] }
 0x309   : > { %v662_v31 = vld [vmem:[#allocation2] sm:$0xff] }
 0x349   : > { %v674_v27 = vpop.permute.xlu1 %673 }
 0x34a   : > { %v676_v29 = vmul.f32 %v674_v27, %v670_v28 }
 0x34c   : > { %678 = vrot.lane.b32.xlu1 %v676_v29, %s973_s27 }
 0x34d   : > { %v666_v30 = vpop.permute.xlu0 %665 }
 0x34e   : > { %v668_v32 = vmul.f32 %v666_v30, %v662_v31 }
 0x3be   : > { %v679_v33 = vpop.permute.xlu1 %678 }
 0x3bf   : > { %v681_v34 = vsel %vm263_vm0, %v668_v32, %v679_v33 }
 0x3c0   : > { %683 = vst.msk [vmem:[%s252_s30] sm:$0xff] %vm682_vm4, %v681_v34 }
 0x3c1 PF: > { %s13_s14 = sadd.s32 1, %s967_s14   ;;  %s1112_s12 = smov %s963_s13 }
 0x3c2   : > { %p10_p5 = scmp.ge.s32.totalorder %s13_s14, 4   ;;  %s1113_s13 = smov %s1115_s15 }
 0x3c4   :  { %12 = sbr.rel (!%p10_p5) target bundleno = 2 (0x2), region = 77 }

// kernel: fwd.5
= control target key start
LH: loop header
LB: loop body
LE: loop exit
PB: predicated region body
PF: predicated region fallthrough
CT: control target
= control target key end

     0   :  { %s2120_s0 = inlined_call_operand.vmem [shape: bf16[2,2,64,8], index: 0, kind: input, shape index: {}]   ;;  %s2121_s1 = inlined_call_operand.vmem [shape: bf16[2,2,64,8], index: 1, kind: input, shape index: {}]   ;;  %s2122_s2 = inlined_call_operand.vmem [shape: bf16[2,2,64,8], index: 2, kind: input, shape index: {}]   ;;  %s2123_s3 = inlined_call_operand.vmem [shape: bf16[2,2,8,8], index: 3, kind: input, shape index: {}]   ;;  %s2124_s4 = inlined_call_operand.vmem [shape: bf16[2,2,8,8], index: 4, kind: input, shape index: {}]   ;;  %s2125_s5 = inlined_call_operand.vmem [shape: f32[2,8,16], index: 5, kind: input, shape index: {}]   ;;  %s2126_s6 = inlined_call_operand.vmem [shape: s32[1,8], index: 6, kind: input, shape index: {}]   ;;  %s2127_s7 = inlined_call_operand.vmem [shape: f32[2,64,16], index: 7, kind: output, shape index: {}]  }
   0x1   :  { %2132 = sst [smem:[#allocation13_spill]] %s2120_s0 }
   0x2   :  { %2133 = sst [smem:[#allocation14_spill]] %s2121_s1 }
   0x3   :  { %2134 = sst [smem:[#allocation15_spill]] %s2126_s6 }
   0x4   :  { %2135 = sst [smem:[#allocation16_spill]] %s2127_s7 }
   0x5   :  { %s1843_s24 = smov 0   ;;  %s1845_s25 = smov 0  }
   0x6   :  { %s1847_s26 = smov 0   ;;  %s1849_s27 = smov 0  }
   0x7   :  { %s1851_s28 = smov 0   ;;  %s1853_s29 = smov 0  }
   0x8   :  { %s1855_s30 = smov 0   ;;  %s1857_s8 = smov 0  }
   0x9   :  { %s1859_s9 = smov 0   ;;  %s1861_s10 = smov 0  }
   0xa   :  { %s1863_s11 = smov 0  }
   0xb LB: > { %2136 = sst [smem:[#allocation8_spill]] %s1768_s28  ;;  %s29_s12 = sadd.s32 1, %s1780_s8  ;;  %s1792_s11 = sphi %s1863_s11, %s17_s11   ;;  %s1788_s10 = sphi %s1861_s10, %s2162_s10   ;;  %s1784_s9 = sphi %s1859_s9, %s2153_s9   ;;  %s1780_s8 = sphi %s1857_s8, %s2161_s8   ;;  %s1776_s30 = sphi %s1855_s30, %s2160_s30   ;;  %s1772_s29 = sphi %s1853_s29, %s2151_s29   ;;  %s1768_s28 = sphi %s1851_s28, %s2159_s28   ;;  %s1764_s27 = sphi %s1849_s27, %s2158_s27   ;;  %s1760_s26 = sphi %s1847_s26, %s2157_s26   ;;  %s1756_s25 = sphi %s1845_s25, %s2156_s25   ;;  %s1752_s24 = sphi %s1843_s24, %s2155_s24  }
   0xc   : > { %2137 = sst [smem:[#allocation9_spill]] %s1784_s9  ;;  %p30_p0 = scmp.ge.s32.totalorder %s29_s12, 3 }
   0xd   : > { %s32_s13 = sadd.s32 1, %s1784_s9  ;;  %s36_s14 = sadd.s32 1, %s1788_s10 }
   0xe   : > { %p52_p1 = scmp.ne.s32.totalorder %s1764_s27, %s1760_s26  ;;  %s2164_s12 = smov (%p30_p0, %s29_s12), 0 }
   0xf   : > { %2138 = sst [smem:[#allocation10_spill]] %s2164_s12  ;;  %s2166_s13 = smov (!%p30_p0, %s32_s13), %s1784_s9 }
  0x10   : > { %p53_p2 = scmp.eq.s32.totalorder %s1792_s11, 0  ;;  %s1415_s15 = sadd.s32 4294967295, %s1784_s9 }
  0x11   : > { %p34_p3 = scmp.ge.s32.totalorder %s2166_s13, 8  ;;  %p69_p4 = scmp.lt.s32.totalorder %s1415_s15, 5 }
  0x12   : > { %p1910_p5 = por %p53_p2, %p52_p1  ;;  %p1416_p6 = scmp.gt.s32.totalorder %s1415_s15, 0 }
  0x13   : > { %s2168_s13 = smov (%p34_p3, %s2166_s13), 0  ;;  %s2170_s14 = smov (!%p34_p3, %s36_s14), %s1788_s10 }
  0x14   : > { %2140 = sst [smem:[#allocation11_spill]] %s2168_s13  ;;  %s41_s17 = ssub.s32 %s1784_s9, %s2168_s13 }
  0x15   : > { %s1421_s18 = sadd.s32 4294967295, %s2168_s13  ;;  %p38_p7 = scmp.ge.s32.totalorder %s2170_s14, 2 }
  0x16   : > { %p75_p8 = scmp.lt.s32.totalorder %s1421_s18, 5  ;;  %s2172_s15 = smov (!%p69_p4, %s1415_s15), 5 }
  0x17   : > { %s2174_s14 = smov (%p38_p7, %s2170_s14), 0  ;;  %s2176_s15 = smov (!%p1416_p6, %s2172_s15), 0 }
  0x18   : > { %2141 = sst [smem:[#allocation12_spill]] %s2174_s14  ;;  %s40_s19 = ssub.s32 %s1788_s10, %s2174_s14 }
  0x19   : > { %s45_s20 = sadd.s32 1, %s1764_s27  ;;  %s42_s21 = sor.u32 %s41_s17, %s40_s19 }
  0x1a   : > { %p1422_p9 = scmp.gt.s32.totalorder %s1421_s18, 0  ;;  %p43_p10 = scmp.eq.s32.totalorder %s42_s21, 0 }
  0x1b   : > { %s1926_s22 = sadd.s32 %s1780_s8, %s2176_s15  ;;  %s2178_s18 = smov (!%p75_p8, %s1421_s18), 5 }
  0x1c   : > { %s1929_s23 = scalar_select %p43_p10, %s1764_s27, %s45_s20  }
  0x1d   : > { %s2180_s18 = smov (!%p1422_p9, %s2178_s18), 0  ;;  %p92_p11 = scmp.ne.s32.totalorder %s1756_s25, %s1752_s24 }
  0x1e   : > { %s79_s13 = sadd.s32 %s2180_s18, %s2164_s12  ;;  %s85_s7 = sadd.s32 1, %s1756_s25 }
  0x1f   : > { %s81_s6 = ssub.s32 %s1926_s22, %s79_s13  ;;  %p1937_p12 = por %p92_p11, %p53_p2 }
  0x20   : > { %s82_s14 = sor.u32 %s81_s6, %s40_s19  ;;  %p1440_p0 = scmp.ge.s32.totalorder %s1792_s11, 48 }
  0x21   : > { %p83_p13 = scmp.eq.s32.totalorder %s82_s14, 0 }
  0x22   : > { %288 = sbr.rel (%p1440_p0) target bundleno = 73 (0x49), region = 20 }
  0x23   : > { %s1943_s17 = scalar_select %p83_p13, %s1756_s25, %s85_s7  }
  0x29   : > { %291 = sbr.rel (!%p1910_p5) target bundleno = 53 (0x35), region = 24  ;;  %s293_s13 = sand.u32 (%p1910_p5), 1, %s1764_s27  }
  0x2a   : > { %s1442_s15 = sshll.u32 (%p1910_p5), %s1788_s10, 4  ;;  %s1441_s18 = sshll.u32 (%p1910_p5), %s293_s13, 3 }
  0x2b   : > { %s297_s20 = sadd.s32 (%p1910_p5), %s1784_s9, %s1442_s15  ;;  %s2143_s0 = sld [smem:[#allocation13_spill]] (%p1910_p5) }
  0x2c   : > { %s1443_s21 = sshll.u32 (%p1910_p5), %s297_s20, 2  ;;  %s295_s7 = scalar_lea.vmem (%p1910_p5), [#allocation5], %s1441_s18 }
  0x31   : > { %s299_s14 = scalar_lea.vmem %s2143_s0, %s1443_s21 }
  0x32   : > { %v315_v0 = vld [vmem:[%s299_s14] sm:$0xf] }
  0x33   : > { %v317_v1 = vld [vmem:[%s299_s14 + $0x20] sm:$0xf]  ;;  %316 = vst [vmem:[%s295_s7] sm:$0xf] %v315_v0 }
  0x34   : > { %318 = vst [vmem:[%s295_s7 + $0x4] sm:$0xf] %v317_v1 }
  0x35 PF: > { %345 = sbr.rel (!%p1937_p12) target bundleno = 65 (0x41), region = 65  ;;  %s347_s16 = sand.u32 (%p1937_p12), 1, %s1756_s25  }
  0x36   : > { %s1451_s19 = sshll.u32 (%p1937_p12), %s1788_s10, 4  ;;  %s1444_s13 = sshll.u32 (%p1937_p12), %s347_s16, 3 }
  0x37   : > { %s357_s15 = sadd.s32 (%p1937_p12), %s1451_s19, %s1926_s22  ;;  %s2144_s1 = sld [smem:[#allocation14_spill]] (%p1937_p12) }
  0x38   : > { %s1452_s20 = sshll.u32 (%p1937_p12), %s357_s15, 2  ;;  %s349_s18 = scalar_lea.vmem (%p1937_p12), [#allocation6], %s1444_s13 }
  0x3d   : > { %s359_s21 = scalar_lea.vmem %s2144_s1, %s1452_s20 }
  0x3e   : > { %v375_v2 = vld [vmem:[%s359_s21] sm:$0xf] }
  0x3f   : > { %v377_v3 = vld [vmem:[%s359_s21 + $0x20] sm:$0xf]  ;;  %376 = vst [vmem:[%s349_s18] sm:$0xf] %v375_v2 }
  0x40   : > { %378 = vst [vmem:[%s349_s18 + $0x4] sm:$0xf] %v377_v3 }
  0x41 PF: > { %405 = sbr.rel (!%p1937_p12) target bundleno = 73 (0x49), region = 106  ;;  %s407_s6 = sand.u32 (%p1937_p12), 1, %s1756_s25  }
  0x42   : > { %s1460_s14 = sshll.u32 (%p1937_p12), %s1788_s10, 4  ;;  %s1453_s7 = sshll.u32 (%p1937_p12), %s407_s6, 3 }
  0x43   : > { %s417_s16 = sadd.s32 (%p1937_p12), %s1460_s14, %s1926_s22  ;;  %s409_s13 = scalar_lea.vmem (%p1937_p12), [#allocation7], %s1453_s7 }
  0x44   : > { %s1461_s19 = sshll.u32 (%p1937_p12), %s417_s16, 2 }
  0x45   : > { %s419_s20 = scalar_lea.vmem (%p1937_p12), %s2122_s2, %s1461_s19 }
  0x46   : > { %v435_v4 = vld [vmem:[%s419_s20] sm:$0xf] (%p1937_p12) }
  0x47   : > { %v437_v5 = vld [vmem:[%s419_s20 + $0x20] sm:$0xf] (%p1937_p12)  ;;  %436 = vst [vmem:[%s409_s13] sm:$0xf] (%p1937_p12), %v435_v4 }
  0x48   : > { %438 = vst [vmem:[%s409_s13 + $0x4] sm:$0xf] %v437_v5 }
  0x49 PF: > { %p1462_p1 = scmp.ge.s32.totalorder %s1792_s11, 1  ;;  %p487_p2 = scmp.lt.s32.totalorder %s1792_s11, 49 }
  0x4b   : > { %p488_p3 = pnand %p1462_p1, %p487_p2 }
  0x4c   : > { %s494_s28 = sand.u32 (!%p488_p3), 1, %s1760_s26   ;;  %s501_s22 = sand.u32 (!%p488_p3), 1, %s1752_s24  }
  0x4d   : > { %491 = sbr.rel (%p488_p3) target bundleno = 1701 (0x6a5), region = 159  ;;  %s1463_s12 = sshll.u32 (!%p488_p3), %s494_s28, 3 }
  0x4e   : > { %s1974_s21 = sshll.u32 (!%p488_p3), %s501_s22, 3  ;;  %p576_p4 = scmp.lt.s32.totalorder (!%p488_p3), %s1776_s30, 1 }
  0x4f   : > { %s496_s18 = scalar_lea.vmem (!%p488_p3), [#allocation5], %s1463_s12  ;;  %p592_p5 = scmp.lt.s32.totalorder (!%p488_p3), %s1772_s29, 7 }
  0x50   : > { %v1977_v6 = vld [vmem:[%s496_s18] sm:$0xf] (!%p488_p3)  ;;  %v1979_v7 = vld [vmem:[%s496_s18 + $0x4] sm:$0xf] (!%p488_p3)  ;;  %s2145_s18 = sld [smem:[#allocation16_spill]] (!%p488_p3)  ;;  %s503_s26 = scalar_lea.vmem (!%p488_p3), [#allocation6], %s1974_s21 }
  0x51   : > { %s510_s0 = scalar_lea.vmem (!%p488_p3), [#allocation7], %s1974_s21  ;;  %s2146_s1 = sld [smem:[#allocation8_spill]] (!%p488_p3) }
  0x54   : > { %s2182_s30 = smov (!%p576_p4, %s1776_s30), 1 }
  0x55   : > { %s593_s6 = scalar_select %p592_p5, %s1772_s29, 7 }
  0x56   : > { %s1984_s14 = sshll.u32 %s2182_s30, 3 }
  0x57   : > { %s580_s24 = scalar_lea.vmem %s2123_s3, %s1984_s14  ;;  %s1994_s15 = scalar_lea.vmem %s2124_s4, %s1984_s14 }
  0x58   : > { %s589_s13 = scalar_lea.vmem %s2125_s5, %s1984_s14  ;;  %s595_s28 = sadd.s32 %s1984_s14, %s593_s6 }
  0x59   : > { %s2001_s30 = sshll.u32 %s595_s28, 3  ;;  %p1473_p6 = scmp.ne.s32.totalorder %s2146_s1, 0 }
  0x5a   : > { %s597_s7 = scalar_lea.vmem %s2145_s18, %s2001_s30  ;;  %v605_v8 = vld [vmem:[%s580_s24] sm:$0xf] (!%p1473_p6)  ;;  %vm609_vm0 = vcmask (!%p1473_p6), 64512   ;;  %v606_v9 = vld [vmem:[%s580_s24 + $0x4] sm:$0xf] (!%p1473_p6)  ;;  %v1794_v10 = vmov (!%p1473_p6), 0.0  }
  0x5b   : > { %604 = sbr.rel (%p1473_p6) target bundleno = 690 (0x2b2), region = 175  ;;  %1536 = vmatprep.subr.bf16.mxu0 (!%p1473_p6), %v1794_v10  ;;  %v614_v11 = vsel (!%p1473_p6), %vm609_vm0, %v605_v8, 0  ;;  %1542 = vmatprep.subr.bf16.mxu1 (!%p1473_p6), %v1794_v10  ;;  %v660_v12 = vsel (!%p1473_p6), %vm609_vm0, %v606_v9, 0  ;;  %vm1795_vm1 = vmmov (!%p1473_p6), 0   ;;  %v607_v23 = vld [vmem:[%s1994_s15] sm:$0xf] (!%p1473_p6) }
  0x5c   : > { %1537 = vmatpush3.bf16.xpose.msra.mxu0 (!%p1473_p6), %v614_v11  ;;  %1543 = vmatpush3.bf16.xpose.msra.mxu1 (!%p1473_p6), %v660_v12  ;;  %vm730_vm2 = vcmask (!%p1473_p6), 1043456   ;;  %v608_v24 = vld [vmem:[%s1994_s15 + $0x4] sm:$0xf] (!%p1473_p6)  ;;  %vm714_vm3 = vcmask (!%p1473_p6), 7168  }
  0x5d   : > { %1538 = vmatprep.mubr.msk.bf16.mxu0 (!%p1473_p6), %vm1795_vm1, %v1794_v10  ;;  %1544 = vmatprep.mubr.msk.bf16.mxu1 (!%p1473_p6), %vm1795_vm1, %v1794_v10  ;;  %v732_v25 = vsel (!%p1473_p6), %vm730_vm2, %v607_v23, 0  ;;  %v778_v26 = vsel (!%p1473_p6), %vm730_vm2, %v608_v24, 0 }
  0x5e   : > { %1548 = vmatprep.subr.bf16.mxu0 (!%p1473_p6), %v1794_v10  ;;  %1554 = vmatprep.subr.bf16.mxu1 (!%p1473_p6), %v1794_v10 }
  0x63   : > { %1539 = vmatmul.mubr.msk.bf16.vlgmr.msra.gmra.mrb[0].mxu0 %vm609_vm0, %v1977_v6  ;;  %1545 = vmatmul.mubr.msk.bf16.vlgmr.msra.gmra.mrb[0].mxu1 %vm609_vm0, %v1979_v7 }
  0x64   : > { %1550 = vmatprep.mubr.msk.bf16.mxu0 %vm1795_vm1, %v1794_v10  ;;  %1556 = vmatprep.mubr.msk.bf16.mxu1 %vm1795_vm1, %v1794_v10 }
  0x65   : > { %1549 = vmatpush3.bf16.msra.mxu0 %v732_v25  ;;  %1555 = vmatpush3.bf16.msra.mxu1 %v778_v26 }
 0x136   : > { %v650_v13 = vpop.f32.mrb[0].mxu0  ;;  %v696_v14 = vpop.f32.mrb[0].mxu1 }
 0x137   : > { %v1540_v15 = vpop.f32.mrb[1].mxu0  ;;  %v1546_v16 = vpop.f32.mrb[1].mxu1  ;;  %v702_v17 = vsel %vm609_vm0, %v650_v13, -inf  ;;  %v705_v22 = vsel %vm609_vm0, %v696_v14, -inf }
 0x138   : > { %703 = vmax.xlane.f32.xlu0 %v702_v17  ;;  %v653_v18 = vpop.f32.mrb[2].mxu0  ;;  %v699_v19 = vpop.f32.mrb[2].mxu1 }
 0x139   : > { %v1541_v20 = vpop.f32.mrb[3].mxu0  ;;  %v1547_v21 = vpop.f32.mrb[3].mxu1 }
 0x13c   : > { %706 = vmax.xlane.f32.xlu0 %v705_v22 }
 0x1c5   : > { %v704_v27 = vpop.xlane.xlu0 %703 }
 0x1c6   : > { %v708_v28 = vsub.f32 %v650_v13, %v704_v27  ;;  %715 = vst.msk [vmem:[#allocation3] sm:$0xff] %vm714_vm3, %v704_v27 }
 0x1c8   : > { %v710_v29 = vmul.f32 1.442695, %v708_v28 }
 0x1c9   : > { %v707_v30 = vpop.xlane.xlu0 %706 }
 0x1ca   : > { %1686 = vpow2.f32 %v710_v29  ;;  %v709_v31 = vsub.f32 %v696_v14, %v707_v30  ;;  %716 = vst.msk [vmem:[#allocation3 + $0x8] sm:$0xff] %vm714_vm3, %v707_v30 }
 0x1cc   : > { %v712_v32 = vmul.f32 1.442695, %v709_v31 }
 0x1ce   : > { %1688 = vpow2.f32 %v712_v32 }
 0x1d4   : > { %v1687_v33 = vpop.eup %1686 }
 0x1d5   : > { %v717_v34 = vsel %vm609_vm0, %v1687_v33, 0.0  ;;  %v725_v35 = vpack.c.bf16 %v1687_v33, %v1687_v33 }
 0x1d6   : > { %718 = vadd.xlane.f32.xlu1 %v717_v34 }
 0x1d7   : > { %1551 = vmatmul.mubr.msk.bf16.vlgmr.msra.gmra.mrb[4].mxu0 %vm609_vm0, %v725_v35 }
 0x1d8   : > { %v1689_v36 = vpop.eup %1688 }
 0x1d9   : > { %v720_v37 = vsel %vm609_vm0, %v1689_v36, 0.0  ;;  %v726_v38 = vpack.c.bf16 %v1689_v36, %v1689_v36 }
 0x1da   : > { %721 = vadd.xlane.f32.xlu1 %v720_v37 }
 0x1db   : > { %1557 = vmatmul.mubr.msk.bf16.vlgmr.msra.gmra.mrb[4].mxu1 %vm609_vm0, %v726_v38 }
 0x263   : > { %v719_v39 = vpop.xlane.xlu1 %718 }
 0x264   : > { %723 = vst.msk [vmem:[#allocation4] sm:$0xff] %vm714_vm3, %v719_v39 }
 0x267   : > { %v722_v40 = vpop.xlane.xlu1 %721 }
 0x268   : > { %724 = vst.msk [vmem:[#allocation4 + $0x8] sm:$0xff] %vm714_vm3, %v722_v40 }
 0x2aa   : > { %v768_v41 = vpop.f32.mrb[4].mxu0 }
 0x2ab   : > { %820 = vst.msk [vmem:[#allocation2] sm:$0xff] %vm609_vm0, %v768_v41  ;;  %v1552_v42 = vpop.f32.mrb[5].mxu0 }
 0x2ac   : > { %v771_v43 = vpop.f32.mrb[6].mxu0 }
 0x2ad   : > { %v1553_v44 = vpop.f32.mrb[7].mxu0 }
 0x2ae   : > { %v814_v45 = vpop.f32.mrb[4].mxu1 }
 0x2af   : > { %821 = vst.msk [vmem:[#allocation2 + $0x8] sm:$0xff] %vm609_vm0, %v814_v45  ;;  %v1558_v46 = vpop.f32.mrb[5].mxu1 }
 0x2b0   : > { %v817_v47 = vpop.f32.mrb[6].mxu1 }
 0x2b1   : > { %v1559_v48 = vpop.f32.mrb[7].mxu1 }
 0x2b2 PF: > { %s2147_s1 = sld [smem:[#allocation8_spill]]  ;;  %s1478_s6 = sadd.s32 4294967295, %s1772_s29 }
 0x2b3   : > { %p823_p7 = scmp.lt.s32.totalorder %s1478_s6, 5  ;;  %p1479_p8 = scmp.gt.s32.totalorder %s1478_s6, 0 }
 0x2b4   : > { %s2032_s24 = sshll.u32 %s1772_s29, 3 }
 0x2b5   : > { %s2184_s6 = smov (!%p823_p7, %s1478_s6), 5  ;;  %s835_s16 = sadd.s32 15, %s2032_s24 }
 0x2b6   : > { %s2186_s6 = smov (!%p1479_p8, %s2184_s6), 0  ;;  %s1487_s9 = sadd.s32 4294967288, %s2032_s24 }
 0x2b8   : > { %s827_s19 = sadd.s32 %s2147_s1, %s2186_s6 }
 0x2b9   : > { %s2036_s15 = sshll.u32 %s827_s19, 3 }
 0x2ba   : > { %s1517_s20 = sadd.s32 8, %s2036_s15  ;;  %p836_p9 = scmp.le.s32.totalorder %s2036_s15, %s835_s16 }
 0x2bb   : > { %s1485_s28 = sadd.s32 4294967295, %s1517_s20 }
 0x2bc   : > { %p833_p10 = scmp.ge.s32.totalorder %s1485_s28, %s1487_s9 }
 0x2be   : > { %p837_p11 = pnand %p836_p9, %p833_p10 }
 0x2bf   : > { %v841_v49 = vld [vmem:[%s503_s26] sm:$0xf] (!%p837_p11)  ;;  %vm845_vm4 = vcmask (!%p837_p11), 64512   ;;  %v842_v50 = vld [vmem:[%s503_s26 + $0x4] sm:$0xf] (!%p837_p11)  ;;  %v1796_v51 = vmov (!%p837_p11), 0.0   ;;  %v938_v54 = vlaneseq (!%p837_p11)  ;;  %v940_v57 = vstv (!%p837_p11), %s2032_s24 }
 0x2c0   : > { %840 = sbr.rel (%p837_p11) target bundleno = 1434 (0x59a), region = 179  ;;  %1560 = vmatprep.subr.bf16.mxu0 (!%p837_p11), %v1796_v51  ;;  %v850_v52 = vsel (!%p837_p11), %vm845_vm4, %v841_v49, 0  ;;  %1566 = vmatprep.subr.bf16.mxu1 (!%p837_p11), %v1796_v51  ;;  %v896_v53 = vsel (!%p837_p11), %vm845_vm4, %v842_v50, 0  ;;  %vm1797_vm5 = vmmov (!%p837_p11), 0   ;;  %v944_v58 = vstv (!%p837_p11), %s2036_s15  ;;  %v955_v13 = vld [vmem:[#allocation3] sm:$0xff] (!%p837_p11)  ;;  %v956_v16 = vld [vmem:[#allocation3 + $0x8] sm:$0xff] (!%p837_p11) }
 0x2c1   : > { %1561 = vmatpush3.bf16.xpose.msra.mxu0 (!%p837_p11), %v850_v52  ;;  %1567 = vmatpush3.bf16.xpose.msra.mxu1 (!%p837_p11), %v896_v53  ;;  %v939_v55 = vshrl.u32 (!%p837_p11), %v938_v54, 7  ;;  %v943_v56 = vand.u32 (!%p837_p11), 127, %v938_v54  ;;  %v1798_v12 = vmov (!%p837_p11), 0   ;;  %vm987_vm7 = vcmask (!%p837_p11), 7168   ;;  %v843_v21 = vld [vmem:[%s510_s0] sm:$0xf] (!%p837_p11) }
 0x2c2   : > { %1562 = vmatprep.mubr.msk.bf16.mxu0 (!%p837_p11), %vm1797_vm5, %v1796_v51  ;;  %1568 = vmatprep.mubr.msk.bf16.mxu1 (!%p837_p11), %vm1797_vm5, %v1796_v51  ;;  %vm1023_vm8 = vcmask (!%p837_p11), 1043456   ;;  %v844_v22 = vld [vmem:[%s510_s0 + $0x4] sm:$0xf] (!%p837_p11)  ;;  %v990_v41 = vld [vmem:[#allocation4] sm:$0xff] (!%p837_p11)  ;;  %v991_v44 = vld [vmem:[#allocation4 + $0x8] sm:$0xff] (!%p837_p11) }
 0x2c3   : > { %1572 = vmatprep.subr.bf16.mxu0 (!%p837_p11), %v1796_v51  ;;  %1578 = vmatprep.subr.bf16.mxu1 (!%p837_p11), %v1796_v51  ;;  %v941_v59 = vadd.s32 (!%p837_p11), %v940_v57, %v939_v55  ;;  %v945_v60 = vadd.s32 (!%p837_p11), %v944_v58, %v943_v56  ;;  %v1025_v23 = vsel (!%p837_p11), %vm1023_vm8, %v843_v21, 0  ;;  %v1071_v24 = vsel (!%p837_p11), %vm1023_vm8, %v844_v22, 0  ;;  %v1004_v49 = vld [vmem:[#allocation2] sm:$0xff] (!%p837_p11)  ;;  %v1005_v52 = vld [vmem:[#allocation2 + $0x8] sm:$0xff] (!%p837_p11) }
 0x2c4   : > { %1690 = vset.pattern.permute.xlu1 (!%p837_p11), %v1798_v12  ;;  %1691 = vset.pattern.permute.xlu0 (!%p837_p11), %v1798_v12 }
 0x2c5   : > { %v946_v61 = vsub.s32 (!%p837_p11), %v941_v59, %v945_v60 }
 0x2c7   : > { %v948_v62 = vsub.s32 0, %v946_v61 }
 0x2c8   : > { %1563 = vmatmul.mubr.msk.bf16.vlgmr.msra.gmra.mrb[0].mxu0 %vm845_vm4, %v1977_v6  ;;  %1569 = vmatmul.mubr.msk.bf16.vlgmr.msra.gmra.mrb[0].mxu1 %vm845_vm4, %v1979_v7 }
 0x2c9   : > { %1574 = vmatprep.mubr.msk.bf16.mxu0 %vm1797_vm5, %v1796_v51  ;;  %1580 = vmatprep.mubr.msk.bf16.mxu1 %vm1797_vm5, %v1796_v51  ;;  %v1491_v63 = vmin.u32 %v948_v62, %v946_v61 }
 0x2ca   : > { %1573 = vmatpush3.bf16.msra.mxu0 %v1025_v23  ;;  %1579 = vmatpush3.bf16.msra.mxu1 %v1071_v24 }
 0x2cb   : > { %vm950_vm6 = vcmp.le.s32.totalorder %v1491_v63, 8 }
 0x39b   : > { %v886_v0 = vpop.f32.mrb[0].mxu0  ;;  %v932_v1 = vpop.f32.mrb[0].mxu1 }
 0x39c   : > { %v953_v2 = vsel %vm950_vm6, %v886_v0, -1e+30  ;;  %v1564_v3 = vpop.f32.mrb[1].mxu0  ;;  %v954_v4 = vsel %vm950_vm6, %v932_v1, -1e+30  ;;  %v1570_v5 = vpop.f32.mrb[1].mxu1 }
 0x39d   : > { %v889_v6 = vpop.f32.mrb[2].mxu0  ;;  %v935_v7 = vpop.f32.mrb[2].mxu1  ;;  %v957_v8 = vsel %vm845_vm4, %v953_v2, -inf  ;;  %v960_v11 = vsel %vm845_vm4, %v954_v4, -inf }
 0x39e   : > { %958 = vmax.xlane.f32.xlu0 %v957_v8  ;;  %v1565_v9 = vpop.f32.mrb[3].mxu0  ;;  %v1571_v10 = vpop.f32.mrb[3].mxu1 }
 0x3a2   : > { %961 = vmax.xlane.f32.xlu0 %v960_v11 }
 0x42b   : > { %v959_v14 = vpop.xlane.xlu0 %958 }
 0x42c   : > { %v963_v15 = vmax.f32 %v955_v13, %v959_v14 }
 0x42e   : > { %v965_v17 = vsub.f32 %v955_v13, %v963_v15  ;;  %988 = vst.msk [vmem:[#allocation3] sm:$0xff] %vm987_vm7, %v963_v15  ;;  %973 = vperm.xlu1 %1690, %v963_v15  }
 0x42f   : > { %v962_v18 = vpop.xlane.xlu0 %961 }
 0x430   : > { %v964_v19 = vmax.f32 %v956_v16, %v962_v18  ;;  %v967_v38 = vmul.f32 1.442695, %v965_v17 }
 0x432   : > { %v966_v20 = vsub.f32 %v956_v16, %v964_v19  ;;  %989 = vst.msk [vmem:[#allocation3 + $0x8] sm:$0xff] %vm987_vm7, %v964_v19  ;;  %978 = vperm.xlu1 %1690, %v964_v19  }
 0x434   : > { %v969_v37 = vmul.f32 1.442695, %v966_v20 }
 0x4ad   : > { %v974_v25 = vpop.permute.xlu1 %973 }
 0x4ae   : > { %v981_v26 = vsub.f32 %v953_v2, %v974_v25 }
 0x4b0   : > { %v983_v27 = vmul.f32 1.442695, %v981_v26 }
 0x4b1   : > { %v979_v28 = vpop.permute.xlu1 %978 }
 0x4b2   : > { %1692 = vpow2.f32 %v983_v27  ;;  %v982_v29 = vsub.f32 %v954_v4, %v979_v28 }
 0x4b4   : > { %v985_v30 = vmul.f32 1.442695, %v982_v29 }
 0x4b6   : > { %1694 = vpow2.f32 %v985_v30 }
 0x4b7   : > { %1696 = vpow2.f32 %v969_v37 }
 0x4b8   : > { %1698 = vpow2.f32 %v967_v38 }
 0x4bc   : > { %v1693_v31 = vpop.eup %1692 }
 0x4bd   : > { %v994_v32 = vsel %vm845_vm4, %v1693_v31, 0.0  ;;  %v1018_v33 = vpack.c.bf16 %v1693_v31, %v1693_v31 }
 0x4be   : > { %995 = vadd.xlane.f32.xlu0 %v994_v32 }
 0x4bf   : > { %1575 = vmatmul.mubr.msk.bf16.vlgmr.msra.gmra.mrb[4].mxu0 %vm845_vm4, %v1018_v33 }
 0x4c0   : > { %v1695_v34 = vpop.eup %1694 }
 0x4c1   : > { %v997_v35 = vsel %vm845_vm4, %v1695_v34, 0.0  ;;  %v1019_v36 = vpack.c.bf16 %v1695_v34, %v1695_v34  ;;  %v1697_v39 = vpop.eup %1696 }
 0x4c2   : > { %998 = vadd.xlane.f32.xlu1 %v997_v35  ;;  %v1699_v40 = vpop.eup %1698  ;;  %v993_v46 = vmul.f32 %v1697_v39, %v991_v44 }
 0x4c3   : > { %1581 = vmatmul.mubr.msk.bf16.vlgmr.msra.gmra.mrb[4].mxu1 %vm845_vm4, %v1019_v36  ;;  %v992_v42 = vmul.f32 %v1699_v40, %v990_v41 }
 0x4d3   : > { %1013 = vperm.xlu1 %1690, %v1697_v39  }
 0x4d4   : > { %1008 = vperm.xlu0 %1691, %v1699_v40  }
 0x54b   : > { %v996_v43 = vpop.xlane.xlu0 %995 }
 0x54c   : > { %v1000_v45 = vadd.f32 %v996_v43, %v992_v42 }
 0x54e   : > { %1002 = vst.msk [vmem:[#allocation4] sm:$0xff] %vm987_vm7, %v1000_v45 }
 0x54f   : > { %v999_v47 = vpop.xlane.xlu1 %998 }
 0x550   : > { %v1001_v48 = vadd.f32 %v999_v47, %v993_v46 }
 0x552   : > { %1003 = vst.msk [vmem:[#allocation4 + $0x8] sm:$0xff] %vm987_vm7, %v1001_v48 }
 0x553   : > { %v1009_v50 = vpop.permute.xlu0 %1008  ;;  %v1014_v53 = vpop.permute.xlu1 %1013 }
 0x554   : > { %v1016_v51 = vmul.f32 %v1009_v50, %v1004_v49  ;;  %v1017_v58 = vmul.f32 %v1014_v53, %v1005_v52 }
 0x592   : > { %v1061_v54 = vpop.f32.mrb[4].mxu0 }
 0x593   : > { %v1113_v55 = vadd.f32 %v1061_v54, %v1016_v51  ;;  %v1576_v56 = vpop.f32.mrb[5].mxu0 }
 0x594   : > { %v1064_v57 = vpop.f32.mrb[6].mxu0 }
 0x595   : > { %1115 = vst.msk [vmem:[#allocation2] sm:$0xff] %vm845_vm4, %v1113_v55  ;;  %v1577_v59 = vpop.f32.mrb[7].mxu0 }
 0x596   : > { %v1107_v60 = vpop.f32.mrb[4].mxu1 }
 0x597   : > { %v1114_v61 = vadd.f32 %v1107_v60, %v1017_v58  ;;  %v1582_v62 = vpop.f32.mrb[5].mxu1 }
 0x598   : > { %v1110_v63 = vpop.f32.mrb[6].mxu1 }
 0x599   : > { %1116 = vst.msk [vmem:[#allocation2 + $0x8] sm:$0xff] %vm845_vm4, %v1114_v61  ;;  %v1583_v0 = vpop.f32.mrb[7].mxu1 }
 0x59a PF: > { %s2148_s0 = sld [smem:[#allocation8_spill]] }
 0x5a0   : > { %p1494_p12 = scmp.ne.s32.totalorder %s2148_s0, 2 }
 0x5a1   : > { %v1122_v1 = vld [vmem:[#allocation4 + $0x8] sm:$0xff] (!%p1494_p12)  ;;  %v1162_v2 = vld [vmem:[%s589_s13] sm:$0xff] (!%p1494_p12)  ;;  %v1799_v3 = vmov (!%p1494_p12), 0   ;;  %v1800_v4 = vmov (!%p1494_p12), 0.0   ;;  %v1146_v5 = vlaneseq (!%p1494_p12)  ;;  %vm1801_vm9 = vmmov (!%p1494_p12), 0   ;;  %s2149_s18 = sld [smem:[#allocation15_spill]] (!%p1494_p12) }
 0x5a2   : > { %1120 = sbr.rel (%p1494_p12) target bundleno = 1701 (0x6a5), region = 183  ;;  %1700 = vset.pattern.permute.xlu0 (!%p1494_p12), %v1799_v3  ;;  %1702 = vrcp.f32 (!%p1494_p12), %v1122_v1  ;;  %1584 = vmatprep.subr.mxu0 (!%p1494_p12), %v1800_v4  ;;  %v1121_v6 = vld [vmem:[#allocation4] sm:$0xff] (!%p1494_p12)  ;;  %v1148_v7 = vstv (!%p1494_p12), %s2032_s24  ;;  %vm1144_vm10 = vcmask (!%p1494_p12), 64512   ;;  %v1133_v15 = vld [vmem:[#allocation2 + $0x8] sm:$0xff] (!%p1494_p12)  ;;  %s1802_s14 = smov (!%p1494_p12), 8   ;;  %vm1239_vm13 = vcmask (!%p1494_p12), 130048  }
 0x5a3   : > { %1585 = vmatpush3.msra.mxu0 (!%p1494_p12), %v1162_v2  ;;  %1586 = vmatprep.mubr.msk.f32.mxu0 (!%p1494_p12), %vm1801_vm9, %v1800_v4  ;;  %1704 = vrcp.f32 (!%p1494_p12), %v1121_v6  ;;  %v1147_v8 = vshrl.u32 (!%p1494_p12), %v1146_v5, 7  ;;  %v1125_v21 = vld [vmem:[#allocation2] sm:$0xff] (!%p1494_p12) }
 0x5a4   : > { %1701 = vset.pattern.permute.xlu1 (!%p1494_p12), %v1799_v3 }
 0x5a5   : > { %v1149_v10 = vadd.s32 (!%p1494_p12), %v1148_v7, %v1147_v8 }
 0x5a7   : > { %v1495_v9 = vld [vmem:[%s2149_s18] ss:$0 sm:$0xff] (!%p1494_p12) }
 0x5a8   : > { %vm1155_vm11 = vcmp.eq.s32.totalorder (!%p1494_p12), %v1149_v10, %v1495_v9 }
 0x5a9   : > { %v1496_v11 = vsel %vm1155_vm11, 1.0, %v1800_v4 }
 0x5aa   : > { %1587 = vmatmul.mubr.msk.f32.vlgmr.msra.gmra.mrb[0].mxu0 %vm1144_vm10, %v1496_v11  ;;  %v1158_v14 = vsel %vm1144_vm10, %v1496_v11, 0.0 }
 0x5ac   : > { %v1703_v12 = vpop.eup %1702 }
 0x5ad   : > { %v1705_v13 = vpop.eup %1704  ;;  %1136 = vperm.xlu0 %1700, %v1703_v12  }
 0x5ae   : > { %1128 = vperm.xlu1 %1701, %v1705_v13  }
 0x5cc   : > { %1159 = vadd.xlane.f32.xlu0 %v1158_v14 }
 0x62c   : > { %v1137_v16 = vpop.permute.xlu0 %1136 }
 0x62d   : > { %v1139_v17 = vmul.f32 %v1137_v16, %v1133_v15  ;;  %v1129_v20 = vpop.permute.xlu1 %1128 }
 0x62e   : > { %v1131_v23 = vmul.f32 %v1129_v20, %v1125_v21 }
 0x62f   : > { %1141 = vrot.lane.b32.xlu1 %v1139_v17, %s1802_s14 }
 0x659   : > { %v1160_v22 = vpop.xlane.xlu0 %1159 }
 0x65a   : > { %vm1161_vm12 = vcmp.gt.f32.partialorder %v1160_v22, 0.0 }
 0x67d   : > { %v1232_v18 = vpop.f32.mrb[0].mxu0 }
 0x67e   : > { %v1588_v19 = vpop.f32.mrb[1].mxu0 }
 0x6a1   : > { %v1142_v24 = vpop.permute.xlu1 %1141 }
 0x6a2   : > { %v1145_v25 = vsel %vm1144_vm10, %v1131_v23, %v1142_v24 }
 0x6a3   : > { %v1238_v26 = vsel %vm1161_vm12, %v1232_v18, %v1145_v25 }
 0x6a4   : > { %1240 = vst.msk [vmem:[%s597_s7] sm:$0xff] %vm1239_vm13, %v1238_v26 }
 0x6a5 PF: > { %s17_s11 = sadd.s32 1, %s1792_s11   ;;  %s2151_s29 = sld [smem:[#allocation9_spill]] }
 0x6a6   : > { %p14_p13 = scmp.ge.s32.totalorder %s17_s11, 50   ;;  %s2152_s6 = sld [smem:[#allocation10_spill]] }
 0x6a7   : > { %s2153_s9 = sld [smem:[#allocation11_spill]]  ;;  %s2154_s16 = sld [smem:[#allocation12_spill]] }
 0x6a8   : > { %s2155_s24 = smov %s1756_s25  ;;  %s2156_s25 = smov %s1943_s17 }
 0x6a9   : > { %s2157_s26 = smov %s1764_s27  ;;  %s2158_s27 = smov %s1929_s23 }
 0x6aa   : > { %s2159_s28 = smov %s1780_s8  ;;  %s2160_s30 = smov %s1788_s10 }
 0x6ab   :  { %16 = sbr.rel (!%p14_p13) target bundleno = 11 (0xb), region = 244 }
 0x6ac   : > { %s2161_s8 = smov %s2152_s6 }
 0x6ad   : > { %s2162_s10 = smov %s2154_s16 }

</bundles_post_ra>
